<compile_context>
chip_gen: v6e
topology: v6e:2x2x1
jax: 0.10.0
libtpu: 0.0.40
codegen_flags: <defaults>
</compile_context>

<pallas_src>
import jax
import jax.numpy as jnp
from jax import lax
from jax.experimental import pallas as pl
from jax.experimental.pallas import tpu as pltpu


_WEIGHT_DTYPE = jnp.bfloat16   # MXU operand dtype for all dense weights
_ACT_DTYPE = jnp.bfloat16      # inter-layer activation (y) dtype
# Scoped VMEM limit: stays below physical VMEM on v5e/v6e (128 MiB) and
# v7x (64 MiB) while raising the small default scoped limit.
_VMEM_LIMIT = 64 * 1024 * 1024


def _round_up(x, m):
    return -(-x // m) * m


def _pick_divisor(n, candidates):
    for c in candidates:
        if n % c == 0:
            return c
    return n


def _to_gate_major(xp, nhid):
    """(S, B, 4H) -> (S, 4, B, H): per-gate, lane-aligned layout."""
    s, b, _ = xp.shape
    return xp.reshape(s, b, 4, nhid).transpose(0, 2, 1, 3)


# ----------------------------------------------------------------------------
# Input projection kernel: xproj = x @ W_ih^T + (b_ih + b_hh), row-tiled.
# ----------------------------------------------------------------------------
def _input_proj_kernel(x_ref, w_ref, b_ref, o_ref):
    o_ref[...] = (jnp.dot(x_ref[...], w_ref[...],
                          preferred_element_type=jnp.float32) + b_ref[...])


def input_projection(x2d, w_t, bias, row_tile=None):
    n, din = x2d.shape
    f = w_t.shape[-1]
    if row_tile is None:
        row_tile = _pick_divisor(n, (512, 256, 128, 64, 32, 16, 8))
    assert n % row_tile == 0
    return pl.pallas_call(
        _input_proj_kernel,
        out_shape=jax.ShapeDtypeStruct((n, f), jnp.float32),
        grid_spec=pltpu.PrefetchScalarGridSpec(
            num_scalar_prefetch=0,
            grid=(n // row_tile,),
            in_specs=[
                pl.BlockSpec((row_tile, din), lambda i: (i, 0)),
                pl.BlockSpec((din, f), lambda i: (0, 0)),
                pl.BlockSpec((1, f), lambda i: (0, 0)),
            ],
            out_specs=pl.BlockSpec((row_tile, f), lambda i: (i, 0)),
        ),
        compiler_params=pltpu.CompilerParams(
            dimension_semantics=("parallel",),
            vmem_limit_bytes=_VMEM_LIMIT),
    )(x2d, w_t, bias)


# ----------------------------------------------------------------------------
# LSTM recurrence kernel: time-chunked grid, h/c carried in VMEM scratch.
# Input xp is the pre-computed (input proj + bias) in gate-major layout.
# ----------------------------------------------------------------------------
def _lstm_recurrence_kernel(xp_ref, whh_ref, h0_ref, c0_ref,
                            y_ref, hT_ref, cT_ref, h_sc, c_sc):
    t0 = pl.program_id(0)
    tc = xp_ref.shape[0]

    @pl.when(t0 == 0)
    def _():
        h_sc[...] = h0_ref[...]
        c_sc[...] = c0_ref[...]

    # Per-gate recurrent weights (lane-aligned tiles), loaded once per chunk.
    w_i = whh_ref[0]
    w_f = whh_ref[1]
    w_g = whh_ref[2]
    w_o = whh_ref[3]

    def step(tl, carry):
        xt = xp_ref[tl]                   # (4, B, H) f32: x@Wih + bias per gate
        h = h_sc[...]
        c = c_sc[...]
        hb = h.astype(w_i.dtype)
        gi = xt[0] + jnp.dot(hb, w_i, preferred_element_type=jnp.float32)
        gf = xt[1] + jnp.dot(hb, w_f, preferred_element_type=jnp.float32)
        gg = xt[2] + jnp.dot(hb, w_g, preferred_element_type=jnp.float32)
        go = xt[3] + jnp.dot(hb, w_o, preferred_element_type=jnp.float32)
        i = jax.nn.sigmoid(gi)
        f = jax.nn.sigmoid(gf)
        g = jnp.tanh(gg)
        o = jax.nn.sigmoid(go)
        c_new = f * c + i * g
        h_new = o * jnp.tanh(c_new)
        h_sc[...] = h_new
        c_sc[...] = c_new
        y_ref[tl] = h_new.astype(y_ref.dtype)
        return carry

    lax.fori_loop(0, tc, step, 0, unroll=True)

    # Final hidden/cell state: write only once, on the last chunk.
    @pl.when(t0 == pl.num_programs(0) - 1)
    def _():
        hT_ref[...] = h_sc[...]
        cT_ref[...] = c_sc[...]


def lstm_recurrence(xp, whh_gates, h0, c0, time_chunk=None):
    """xp: (S, 4, B, H) f32 pre-projected gates; whh_gates: (4, H, H) bf16.

    Returns (y (S,B,H) bf16, hT (B,H) f32, cT (B,H) f32)."""
    s, _, b, h = xp.shape
    if time_chunk is None:
        # TODO(synk): at production sizes, tune time_chunk against VMEM
        # (xp chunk is Tc*4*B*H*4 bytes, double-buffered).
        time_chunk = _pick_divisor(s, (16, 8, 4, 2, 1))
    tc = time_chunk
    assert s % tc == 0
    return pl.pallas_call(
        _lstm_recurrence_kernel,
        out_shape=(jax.ShapeDtypeStruct((s, b, h), _ACT_DTYPE),
                   jax.ShapeDtypeStruct((b, h), jnp.float32),
                   jax.ShapeDtypeStruct((b, h), jnp.float32)),
        grid_spec=pltpu.PrefetchScalarGridSpec(
            num_scalar_prefetch=0,
            grid=(s // tc,),
            in_specs=[
                pl.BlockSpec((tc, 4, b, h), lambda t: (t, 0, 0, 0)),
                pl.BlockSpec((4, h, h), lambda t: (0, 0, 0)),
                pl.BlockSpec((b, h), lambda t: (0, 0)),
                pl.BlockSpec((b, h), lambda t: (0, 0)),
            ],
            out_specs=[
                pl.BlockSpec((tc, b, h), lambda t: (t, 0, 0)),
                pl.BlockSpec((b, h), lambda t: (0, 0)),
                pl.BlockSpec((b, h), lambda t: (0, 0)),
            ],
            scratch_shapes=[pltpu.VMEM((b, h), jnp.float32),
                            pltpu.VMEM((b, h), jnp.float32)],
        ),
        compiler_params=pltpu.CompilerParams(
            dimension_semantics=("arbitrary",),
            vmem_limit_bytes=_VMEM_LIMIT),
    )(xp, whh_gates, h0, c0)


# ----------------------------------------------------------------------------
# Head kernel 1: bottleneck + decoder logits + online logsumexp over V tiles.
#   bn = tanh(out @ Wl + ivec' @ Wi + b)   (ivec amplification folded into Wi)
#   logits = bn @ Wd + bd ; lse = logsumexp(logits, axis=-1)
# ----------------------------------------------------------------------------
def _bn_decoder_lse_kernel(y_ref, iv_ref, wl_ref, wi_ref, bc_ref, wd_ref,
                           bd_ref, logits_ref, lse_ref, bn_sc, m_sc, l_sc):
    j = pl.program_id(1)

    @pl.when(j == 0)
    def _():
        bn = jnp.tanh(
            jnp.dot(y_ref[...].astype(wl_ref.dtype), wl_ref[...],
                    preferred_element_type=jnp.float32)
            + jnp.dot(iv_ref[...].astype(wi_ref.dtype), wi_ref[...],
                      preferred_element_type=jnp.float32)
            + bc_ref[...])
        bn_sc[...] = bn.astype(bn_sc.dtype)
        m_sc[...] = jnp.full(m_sc.shape, -jnp.inf, m_sc.dtype)
        l_sc[...] = jnp.zeros(l_sc.shape, l_sc.dtype)

    logits = (jnp.dot(bn_sc[...], wd_ref[...],
                      preferred_element_type=jnp.float32) + bd_ref[...])
    logits_ref[...] = logits

    m_prev = m_sc[...]
    m_new = jnp.maximum(m_prev, jnp.max(logits, axis=-1, keepdims=True))
    l_sc[...] = (l_sc[...] * jnp.exp(m_prev - m_new)
                 + jnp.sum(jnp.exp(logits - m_new), axis=-1, keepdims=True))
    m_sc[...] = m_new

    @pl.when(j == pl.num_programs(1) - 1)
    def _():
        lse_ref[...] = m_sc[...] + jnp.log(l_sc[...])


# Head kernel 2: log_probs = logits - lse (lane-dense elementwise tiles).
def _logsoftmax_apply_kernel(logits_ref, lse_ref, out_ref):
    out_ref[...] = logits_ref[...] - lse_ref[...]


def bottleneck_decoder_head(y2d, ivec2d, wl_t, wi_t, bc, wd_t, bd,
                            row_tile=None, vocab_tile=None):
    """y2d: (N, H), ivec2d: (N, Div) -> log-softmax logits (N, V) f32."""
    n, h = y2d.shape
    div = ivec2d.shape[-1]
    v = wd_t.shape[-1]
    if row_tile is None:
        row_tile = _pick_divisor(n, (256, 128, 64, 32, 16, 8))
    if vocab_tile is None:
        vocab_tile = _pick_divisor(v, (2048, 1024, 512, 256, 128))
    tn, tv = row_tile, vocab_tile
    assert n % tn == 0 and v % tv == 0
    nt, vt = n // tn, v // tv

    logits, lse = pl.pallas_call(
        _bn_decoder_lse_kernel,
        out_shape=(jax.ShapeDtypeStruct((n, v), jnp.float32),
                   jax.ShapeDtypeStruct((n, 1), jnp.float32)),
        grid_spec=pltpu.PrefetchScalarGridSpec(
            num_scalar_prefetch=0,
            grid=(nt, vt),
            in_specs=[
                pl.BlockSpec((tn, h), lambda i, j: (i, 0)),
                pl.BlockSpec((tn, div), lambda i, j: (i, 0)),
                pl.BlockSpec((h, h), lambda i, j: (0, 0)),
                pl.BlockSpec((div, h), lambda i, j: (0, 0)),
                pl.BlockSpec((1, h), lambda i, j: (0, 0)),
                pl.BlockSpec((h, tv), lambda i, j: (0, j)),
                pl.BlockSpec((1, tv), lambda i, j: (0, j)),
            ],
            out_specs=[
                pl.BlockSpec((tn, tv), lambda i, j: (i, j)),
                pl.BlockSpec((tn, 1), lambda i, j: (i, 0)),
            ],
            scratch_shapes=[pltpu.VMEM((tn, h), wd_t.dtype),
                            pltpu.VMEM((tn, 1), jnp.float32),
                            pltpu.VMEM((tn, 1), jnp.float32)],
        ),
        compiler_params=pltpu.CompilerParams(
            dimension_semantics=("parallel", "arbitrary"),
            vmem_limit_bytes=_VMEM_LIMIT),
    )(y2d, ivec2d, wl_t, wi_t, bc, wd_t, bd)

    return pl.pallas_call(
        _logsoftmax_apply_kernel,
        out_shape=jax.ShapeDtypeStruct((n, v), jnp.float32),
        grid_spec=pltpu.PrefetchScalarGridSpec(
            num_scalar_prefetch=0,
            grid=(nt, vt),
            in_specs=[pl.BlockSpec((tn, tv), lambda i, j: (i, j)),
                      pl.BlockSpec((tn, 1), lambda i, j: (i, 0))],
            out_specs=pl.BlockSpec((tn, tv), lambda i, j: (i, j)),
        ),
        compiler_params=pltpu.CompilerParams(
            dimension_semantics=("parallel", "parallel"),
            vmem_limit_bytes=_VMEM_LIMIT),
    )(logits, lse)


# ----------------------------------------------------------------------------
# Parameter setup (plain JAX glue; folds everything foldable at setup time).
# ----------------------------------------------------------------------------
def init_params(key, ntoken, ninp, nhid, nlayers, ivec_dim,
                ivec_amplification=1.0, weight_dtype=_WEIGHT_DTYPE):
    keys = jax.random.split(key, 8 + 4 * nlayers)
    initrange = 0.1
    r = 1.0 / (nhid ** 0.5)

    enc = jax.random.uniform(keys[0], (ntoken, ninp), jnp.float32,
                             -initrange, initrange)

    lstm = []
    enc_proj = None
    for l in range(nlayers):
        din = ninp if l == 0 else nhid
        k = keys[1 + 4 * l:1 + 4 * (l + 1)]
        wih = jax.random.uniform(k[0], (4 * nhid, din), jnp.float32, -r, r)
        whh = jax.random.uniform(k[1], (4 * nhid, nhid), jnp.float32, -r, r)
        bih = jax.random.uniform(k[2], (4 * nhid,), jnp.float32, -r, r)
        bhh = jax.random.uniform(k[3], (4 * nhid,), jnp.float32, -r, r)
        bias = (bih + bhh)[None, :]                            # (1, 4H) f32
        lstm.append(dict(
            wih_t=wih.T.astype(weight_dtype),                  # (Din, 4H)
            # per-gate (H_in, H_out) stack, PyTorch gate order i,f,g,o
            whh_gates=jnp.swapaxes(whh.reshape(4, nhid, nhid), 1, 2)
                         .astype(weight_dtype),
            bias=bias,
        ))
        if l == 0:
            # Fold layer-0 input projection into the embedding table.
            enc_proj = enc @ wih.T + bias                      # (ntoken, 4H)

    kk = keys[1 + 4 * nlayers:]
    # weight_norm(dim=0) applied right after init is the identity reparam.
    wl = jax.random.uniform(kk[0], (nhid, nhid), jnp.float32,
                            -initrange, initrange)
    bl = jax.random.uniform(kk[1], (1, nhid), jnp.float32, -r, r)
    wi = jax.random.uniform(kk[2], (nhid, ivec_dim), jnp.float32,
                            -initrange, initrange)
    bi = jnp.zeros((1, nhid), jnp.float32)
    dec_w = jax.random.uniform(kk[3], (ntoken, nhid), jnp.float32,
                               -initrange, initrange)
    dec_b = jnp.zeros((1, ntoken), jnp.float32)

    return dict(
        encoder=enc,
        enc_proj=enc_proj,                                     # (ntoken, 4H)
        lstm=lstm,
        bn_lstm_w_t=wl.T.astype(weight_dtype),                 # (H, H)
        # ivec_amplification folded into the ivec projection weight.
        bn_ivec_w_t=(ivec_amplification * wi.T).astype(weight_dtype),
        bn_bias=bl + bi,                                       # (1, H)
        dec_w_t=dec_w.T.astype(weight_dtype),                  # (H, V)
        dec_b=dec_b,                                           # (1, V)
    )


# ----------------------------------------------------------------------------
# Full forward (matches OutputBottleneckLM.forward, eval mode).
# ----------------------------------------------------------------------------
def output_bottleneck_lm_forward(params, tokens, hidden, ivec,
                                 head_row_tile=None, head_vocab_tile=None):
    """tokens: (S, B) int32; hidden: (h0, c0) each (L, B, H);
    ivec: (S, B, Divec).  Returns (log_probs (S,B,V) f32, (hT, cT))."""
    h0_all, c0_all = hidden
    s, b = tokens.shape
    nlayers, _, h = h0_all.shape
    v = params["dec_w_t"].shape[-1]
    div = ivec.shape[-1]

    # Pad batch to a multiple of 8 so state tiles fill sublanes.
    bp = _round_up(b, 8)
    if bp != b:
        pad = bp - b
        tokens = jnp.pad(tokens, ((0, 0), (0, pad)))
        ivec = jnp.pad(ivec, ((0, 0), (0, pad), (0, 0)))
        h0_all = jnp.pad(h0_all, ((0, 0), (0, pad), (0, 0)))
        c0_all = jnp.pad(c0_all, ((0, 0), (0, pad), (0, 0)))

    # Dropout layers are identity (eval).  Layer-0 input projection is a
    # gather of the pre-projected embedding table (encoder @ Wih0 + b0).
    xp = _to_gate_major(jnp.take(params["enc_proj"], tokens, axis=0), h)

    h_fin, c_fin = [], []
    y = None
    for l in range(nlayers):
        lp = params["lstm"][l]
        if l > 0:
            xp2d = input_projection(y.reshape(s * bp, h),
                                    lp["wih_t"], lp["bias"])
            xp = _to_gate_major(xp2d.reshape(s, bp, 4 * h), h)
        y, hT, cT = lstm_recurrence(xp, lp["whh_gates"], h0_all[l], c0_all[l])
        h_fin.append(hT)
        c_fin.append(cT)

    n = s * bp
    dec_flat = bottleneck_decoder_head(
        y.reshape(n, h), ivec.reshape(n, div),
        params["bn_lstm_w_t"], params["bn_ivec_w_t"], params["bn_bias"],
        params["dec_w_t"], params["dec_b"],
        row_tile=head_row_tile, vocab_tile=head_vocab_tile)

    decoded = dec_flat.reshape(s, bp, v)[:, :b]
    hT_all = jnp.stack(h_fin, axis=0)[:, :b]
    cT_all = jnp.stack(c_fin, axis=0)[:, :b]
    return decoded, (hT_all, cT_all)


if __name__ == "__main__":
    ntoken, ninp, nhid, nlayers, ivec_dim = 256, 32, 32, 2, 16
    seq, batch = 8, 4
    ivec_amplification = 2.0

    key = jax.random.PRNGKey(0)
    kp, kt, ki = jax.random.split(key, 3)
    params = init_params(kp, ntoken, ninp, nhid, nlayers, ivec_dim,
                         ivec_amplification=ivec_amplification)

    tokens = jax.random.randint(kt, (seq, batch), 0, ntoken, dtype=jnp.int32)
    ivec = jax.random.normal(ki, (seq, batch, ivec_dim), jnp.float32)
    h0 = jnp.zeros((nlayers, batch, nhid), jnp.float32)
    c0 = jnp.zeros((nlayers, batch, nhid), jnp.float32)

    # head_vocab_tile=128 -> 2 vocab tiles, exercising the online logsumexp.
    decoded, (hT, cT) = output_bottleneck_lm_forward(
        params, tokens, (h0, c0), ivec, head_vocab_tile=128)
    jax.block_until_ready((decoded, hT, cT))

    # sanity: log-softmax rows must exponentiate-and-sum to 1
    row_sums = jnp.sum(jnp.exp(decoded), axis=-1)
    assert decoded.shape == (seq, batch, ntoken)
    assert hT.shape == (nlayers, batch, nhid) and cT.shape == hT.shape
    assert bool(jnp.all(jnp.isfinite(decoded)))
    assert bool(jnp.allclose(row_sums, 1.0, atol=1e-4))
    print("KERNEL_OK")
</pallas_src>

<mosaic_0001>
module attributes {stable_mosaic.version = 11 : i64} {
  func.func @_lstm_recurrence_kernel(%arg0: i32, %arg1: memref<8x4x8x32xf32, #tpu.memory_space<vmem>>, %arg2: memref<4x32x32xbf16, #tpu.memory_space<vmem>>, %arg3: memref<8x32xf32, #tpu.memory_space<vmem>>, %arg4: memref<8x32xf32, #tpu.memory_space<vmem>>, %arg5: memref<8x8x32xbf16, #tpu.memory_space<vmem>>, %arg6: memref<8x32xf32, #tpu.memory_space<vmem>>, %arg7: memref<8x32xf32, #tpu.memory_space<vmem>>, %arg8: memref<8x32xf32, #tpu.memory_space<vmem>>, %arg9: memref<8x32xf32, #tpu.memory_space<vmem>>) attributes {dimension_semantics = [#tpu.dimension_semantics<arbitrary>], iteration_bounds = array<i64: 1>, scalar_prefetch = 0 : i64, scratch_operands = 2 : i64, tpu.core_type = #tpu.core_type<tc>, window_params = [{transform_indices = @transform_0, window_bounds = array<i64: 8, 4, 8, 32>}, {pipeline_mode = #tpu.pipeline_mode<synchronous>, transform_indices = @transform_1, window_bounds = array<i64: 4, 32, 32>}, {pipeline_mode = #tpu.pipeline_mode<synchronous>, transform_indices = @transform_2, window_bounds = array<i64: 8, 32>}, {pipeline_mode = #tpu.pipeline_mode<synchronous>, transform_indices = @transform_3, window_bounds = array<i64: 8, 32>}, {transform_indices = @transform_4, window_bounds = array<i64: 8, 8, 32>}, {pipeline_mode = #tpu.pipeline_mode<synchronous>, transform_indices = @transform_5, window_bounds = array<i64: 8, 32>}, {pipeline_mode = #tpu.pipeline_mode<synchronous>, transform_indices = @transform_6, window_bounds = array<i64: 8, 32>}]} {
    %c0_i32 = arith.constant 0 : i32
    %0 = arith.cmpi eq, %arg0, %c0_i32 : i32
    %1 = arith.extui %0 : i1 to i32
    %c0_i32_0 = arith.constant 0 : i32
    %2 = arith.cmpi ne, %1, %c0_i32_0 : i32
    scf.if %2 {
      %c0_171 = arith.constant 0 : index
      %c0_172 = arith.constant 0 : index
      %414 = vector.load %arg3[%c0_171, %c0_172] : memref<8x32xf32, #tpu.memory_space<vmem>>, vector<8x32xf32>
      %c0_173 = arith.constant 0 : index
      %c0_174 = arith.constant 0 : index
      %415 = vector.load %arg8[%c0_173, %c0_174] : memref<8x32xf32, #tpu.memory_space<vmem>>, vector<8x32xf32>
      tpu.vector_store %arg8[%c0_173, %c0_174], %414 {strides = array<i32>} : memref<8x32xf32, #tpu.memory_space<vmem>>, vector<8x32xf32>,
      %c0_175 = arith.constant 0 : index
      %c0_176 = arith.constant 0 : index
      %416 = vector.load %arg4[%c0_175, %c0_176] : memref<8x32xf32, #tpu.memory_space<vmem>>, vector<8x32xf32>
      %c0_177 = arith.constant 0 : index
      %c0_178 = arith.constant 0 : index
      %417 = vector.load %arg9[%c0_177, %c0_178] : memref<8x32xf32, #tpu.memory_space<vmem>>, vector<8x32xf32>
      tpu.vector_store %arg9[%c0_177, %c0_178], %416 {strides = array<i32>} : memref<8x32xf32, #tpu.memory_space<vmem>>, vector<8x32xf32>,
    } else {
    }
    %c0 = arith.constant 0 : index
    %c0_1 = arith.constant 0 : index
    %c0_2 = arith.constant 0 : index
    %3 = vector.load %arg2[%c0, %c0_1, %c0_2] : memref<4x32x32xbf16, #tpu.memory_space<vmem>>, vector<1x32x32xbf16>
    %4 = vector.shape_cast %3 : vector<1x32x32xbf16> to vector<32x32xbf16>
    %c1 = arith.constant 1 : index
    %c0_3 = arith.constant 0 : index
    %c0_4 = arith.constant 0 : index
    %5 = vector.load %arg2[%c1, %c0_3, %c0_4] : memref<4x32x32xbf16, #tpu.memory_space<vmem>>, vector<1x32x32xbf16>
    %6 = vector.shape_cast %5 : vector<1x32x32xbf16> to vector<32x32xbf16>
    %c2 = arith.constant 2 : index
    %c0_5 = arith.constant 0 : index
    %c0_6 = arith.constant 0 : index
    %7 = vector.load %arg2[%c2, %c0_5, %c0_6] : memref<4x32x32xbf16, #tpu.memory_space<vmem>>, vector<1x32x32xbf16>
    %8 = vector.shape_cast %7 : vector<1x32x32xbf16> to vector<32x32xbf16>
    %c3 = arith.constant 3 : index
    %c0_7 = arith.constant 0 : index
    %c0_8 = arith.constant 0 : index
    %9 = vector.load %arg2[%c3, %c0_7, %c0_8] : memref<4x32x32xbf16, #tpu.memory_space<vmem>>, vector<1x32x32xbf16>
    %10 = vector.shape_cast %9 : vector<1x32x32xbf16> to vector<32x32xbf16>
    %c0_i32_9 = arith.constant 0 : i32
    %11 = arith.index_cast %c0_i32_9 : i32 to index
    %c0_10 = arith.constant 0 : index
    %c0_11 = arith.constant 0 : index
    %c0_12 = arith.constant 0 : index
    %12 = vector.load %arg1[%11, %c0_10, %c0_11, %c0_12] : memref<8x4x8x32xf32, #tpu.memory_space<vmem>>, vector<1x4x8x32xf32>
    %13 = vector.shape_cast %12 : vector<1x4x8x32xf32> to vector<4x8x32xf32>
    %c0_13 = arith.constant 0 : index
    %c0_14 = arith.constant 0 : index
    %14 = vector.load %arg8[%c0_13, %c0_14] : memref<8x32xf32, #tpu.memory_space<vmem>>, vector<8x32xf32>
    %c0_15 = arith.constant 0 : index
    %c0_16 = arith.constant 0 : index
    %15 = vector.load %arg9[%c0_15, %c0_16] : memref<8x32xf32, #tpu.memory_space<vmem>>, vector<8x32xf32>
    %16 = arith.truncf %14 : vector<8x32xf32> to vector<8x32xbf16>
    %17 = vector.extract_strided_slice %13 {offsets = [0, 0, 0], sizes = [1, 8, 32], strides = [1, 1, 1]} : vector<4x8x32xf32> to vector<1x8x32xf32>
    %18 = vector.shape_cast %17 : vector<1x8x32xf32> to vector<8x32xf32>
    %cst = arith.constant dense<0.000000e+00> : vector<8x32xf32>
    %19 = tpu.matmul %16, %4, %cst {dimension_numbers = #tpu.dot_dimension_numbers<[1], [0], [0], [1], [0, 0, 1, 1], [], []>} : vector<8x32xbf16>, vector<32x32xbf16>, vector<8x32xf32> -> vector<8x32xf32>
    %20 = arith.addf %18, %19 : vector<8x32xf32>
    %21 = vector.extract_strided_slice %13 {offsets = [1, 0, 0], sizes = [1, 8, 32], strides = [1, 1, 1]} : vector<4x8x32xf32> to vector<1x8x32xf32>
    %22 = vector.shape_cast %21 : vector<1x8x32xf32> to vector<8x32xf32>
    %cst_17 = arith.constant dense<0.000000e+00> : vector<8x32xf32>
    %23 = tpu.matmul %16, %6, %cst_17 {dimension_numbers = #tpu.dot_dimension_numbers<[1], [0], [0], [1], [0, 0, 1, 1], [], []>} : vector<8x32xbf16>, vector<32x32xbf16>, vector<8x32xf32> -> vector<8x32xf32>
    %24 = arith.addf %22, %23 : vector<8x32xf32>
    %25 = vector.extract_strided_slice %13 {offsets = [2, 0, 0], sizes = [1, 8, 32], strides = [1, 1, 1]} : vector<4x8x32xf32> to vector<1x8x32xf32>
    %26 = vector.shape_cast %25 : vector<1x8x32xf32> to vector<8x32xf32>
    %cst_18 = arith.constant dense<0.000000e+00> : vector<8x32xf32>
    %27 = tpu.matmul %16, %8, %cst_18 {dimension_numbers = #tpu.dot_dimension_numbers<[1], [0], [0], [1], [0, 0, 1, 1], [], []>} : vector<8x32xbf16>, vector<32x32xbf16>, vector<8x32xf32> -> vector<8x32xf32>
    %28 = arith.addf %26, %27 : vector<8x32xf32>
    %29 = vector.extract_strided_slice %13 {offsets = [3, 0, 0], sizes = [1, 8, 32], strides = [1, 1, 1]} : vector<4x8x32xf32> to vector<1x8x32xf32>
    %30 = vector.shape_cast %29 : vector<1x8x32xf32> to vector<8x32xf32>
    %cst_19 = arith.constant dense<0.000000e+00> : vector<8x32xf32>
    %31 = tpu.matmul %16, %10, %cst_19 {dimension_numbers = #tpu.dot_dimension_numbers<[1], [0], [0], [1], [0, 0, 1, 1], [], []>} : vector<8x32xbf16>, vector<32x32xbf16>, vector<8x32xf32> -> vector<8x32xf32>
    %32 = arith.addf %30, %31 : vector<8x32xf32>
    %33 = arith.negf %20 : vector<8x32xf32>
    %34 = math.exp %33 : vector<8x32xf32>
    %cst_20 = arith.constant 1.000000e+00 : f32
    %35 = vector.broadcast %cst_20 : f32 to vector<8x32xf32>
    %36 = arith.addf %35, %34 : vector<8x32xf32>
    %37 = arith.divf %35, %36 : vector<8x32xf32>
    %38 = arith.negf %24 : vector<8x32xf32>
    %39 = math.exp %38 : vector<8x32xf32>
    %cst_21 = arith.constant 1.000000e+00 : f32
    %40 = vector.broadcast %cst_21 : f32 to vector<8x32xf32>
    %41 = arith.addf %40, %39 : vector<8x32xf32>
    %42 = arith.divf %40, %41 : vector<8x32xf32>
    %43 = math.tanh %28 : vector<8x32xf32>
    %44 = arith.negf %32 : vector<8x32xf32>
    %45 = math.exp %44 : vector<8x32xf32>
    %cst_22 = arith.constant 1.000000e+00 : f32
    %46 = vector.broadcast %cst_22 : f32 to vector<8x32xf32>
    %47 = arith.addf %46, %45 : vector<8x32xf32>
    %48 = arith.divf %46, %47 : vector<8x32xf32>
    %49 = arith.mulf %42, %15 : vector<8x32xf32>
    %50 = arith.mulf %37, %43 : vector<8x32xf32>
    %51 = arith.addf %49, %50 : vector<8x32xf32>
    %52 = math.tanh %51 : vector<8x32xf32>
    %53 = arith.mulf %48, %52 : vector<8x32xf32>
    %c0_23 = arith.constant 0 : index
    %c0_24 = arith.constant 0 : index
    %54 = vector.load %arg8[%c0_23, %c0_24] : memref<8x32xf32, #tpu.memory_space<vmem>>, vector<8x32xf32>
    tpu.vector_store %arg8[%c0_23, %c0_24], %53 {strides = array<i32>} : memref<8x32xf32, #tpu.memory_space<vmem>>, vector<8x32xf32>,
    %c0_25 = arith.constant 0 : index
    %c0_26 = arith.constant 0 : index
    %55 = vector.load %arg9[%c0_25, %c0_26] : memref<8x32xf32, #tpu.memory_space<vmem>>, vector<8x32xf32>
    tpu.vector_store %arg9[%c0_25, %c0_26], %51 {strides = array<i32>} : memref<8x32xf32, #tpu.memory_space<vmem>>, vector<8x32xf32>,
    %56 = arith.truncf %53 : vector<8x32xf32> to vector<8x32xbf16>
    %57 = arith.index_cast %c0_i32_9 : i32 to index
    %c0_27 = arith.constant 0 : index
    %c0_28 = arith.constant 0 : index
    %58 = vector.load %arg5[%57, %c0_27, %c0_28] : memref<8x8x32xbf16, #tpu.memory_space<vmem>>, vector<1x8x32xbf16>
    %59 = vector.shape_cast %58 : vector<1x8x32xbf16> to vector<8x32xbf16>
    %60 = vector.shape_cast %56 : vector<8x32xbf16> to vector<1x8x32xbf16>
    tpu.vector_store %arg5[%57, %c0_27, %c0_28], %60 {strides = array<i32>} : memref<8x8x32xbf16, #tpu.memory_space<vmem>>, vector<1x8x32xbf16>,
    %c1_i32 = arith.constant 1 : i32
    %61 = arith.index_cast %c1_i32 : i32 to index
    %c0_29 = arith.constant 0 : index
    %c0_30 = arith.constant 0 : index
    %c0_31 = arith.constant 0 : index
    %62 = vector.load %arg1[%61, %c0_29, %c0_30, %c0_31] : memref<8x4x8x32xf32, #tpu.memory_space<vmem>>, vector<1x4x8x32xf32>
    %63 = vector.shape_cast %62 : vector<1x4x8x32xf32> to vector<4x8x32xf32>
    %c0_32 = arith.constant 0 : index
    %c0_33 = arith.constant 0 : index
    %64 = vector.load %arg8[%c0_32, %c0_33] : memref<8x32xf32, #tpu.memory_space<vmem>>, vector<8x32xf32>
    %c0_34 = arith.constant 0 : index
    %c0_35 = arith.constant 0 : index
    %65 = vector.load %arg9[%c0_34, %c0_35] : memref<8x32xf32, #tpu.memory_space<vmem>>, vector<8x32xf32>
    %66 = arith.truncf %64 : vector<8x32xf32> to vector<8x32xbf16>
    %67 = vector.extract_strided_slice %63 {offsets = [0, 0, 0], sizes = [1, 8, 32], strides = [1, 1, 1]} : vector<4x8x32xf32> to vector<1x8x32xf32>
    %68 = vector.shape_cast %67 : vector<1x8x32xf32> to vector<8x32xf32>
    %cst_36 = arith.constant dense<0.000000e+00> : vector<8x32xf32>
    %69 = tpu.matmul %66, %4, %cst_36 {dimension_numbers = #tpu.dot_dimension_numbers<[1], [0], [0], [1], [0, 0, 1, 1], [], []>} : vector<8x32xbf16>, vector<32x32xbf16>, vector<8x32xf32> -> vector<8x32xf32>
    %70 = arith.addf %68, %69 : vector<8x32xf32>
    %71 = vector.extract_strided_slice %63 {offsets = [1, 0, 0], sizes = [1, 8, 32], strides = [1, 1, 1]} : vector<4x8x32xf32> to vector<1x8x32xf32>
    %72 = vector.shape_cast %71 : vector<1x8x32xf32> to vector<8x32xf32>
    %cst_37 = arith.constant dense<0.000000e+00> : vector<8x32xf32>
    %73 = tpu.matmul %66, %6, %cst_37 {dimension_numbers = #tpu.dot_dimension_numbers<[1], [0], [0], [1], [0, 0, 1, 1], [], []>} : vector<8x32xbf16>, vector<32x32xbf16>, vector<8x32xf32> -> vector<8x32xf32>
    %74 = arith.addf %72, %73 : vector<8x32xf32>
    %75 = vector.extract_strided_slice %63 {offsets = [2, 0, 0], sizes = [1, 8, 32], strides = [1, 1, 1]} : vector<4x8x32xf32> to vector<1x8x32xf32>
    %76 = vector.shape_cast %75 : vector<1x8x32xf32> to vector<8x32xf32>
    %cst_38 = arith.constant dense<0.000000e+00> : vector<8x32xf32>
    %77 = tpu.matmul %66, %8, %cst_38 {dimension_numbers = #tpu.dot_dimension_numbers<[1], [0], [0], [1], [0, 0, 1, 1], [], []>} : vector<8x32xbf16>, vector<32x32xbf16>, vector<8x32xf32> -> vector<8x32xf32>
    %78 = arith.addf %76, %77 : vector<8x32xf32>
    %79 = vector.extract_strided_slice %63 {offsets = [3, 0, 0], sizes = [1, 8, 32], strides = [1, 1, 1]} : vector<4x8x32xf32> to vector<1x8x32xf32>
    %80 = vector.shape_cast %79 : vector<1x8x32xf32> to vector<8x32xf32>
    %cst_39 = arith.constant dense<0.000000e+00> : vector<8x32xf32>
    %81 = tpu.matmul %66, %10, %cst_39 {dimension_numbers = #tpu.dot_dimension_numbers<[1], [0], [0], [1], [0, 0, 1, 1], [], []>} : vector<8x32xbf16>, vector<32x32xbf16>, vector<8x32xf32> -> vector<8x32xf32>
    %82 = arith.addf %80, %81 : vector<8x32xf32>
    %83 = arith.negf %70 : vector<8x32xf32>
    %84 = math.exp %83 : vector<8x32xf32>
    %cst_40 = arith.constant 1.000000e+00 : f32
    %85 = vector.broadcast %cst_40 : f32 to vector<8x32xf32>
    %86 = arith.addf %85, %84 : vector<8x32xf32>
    %87 = arith.divf %85, %86 : vector<8x32xf32>
    %88 = arith.negf %74 : vector<8x32xf32>
    %89 = math.exp %88 : vector<8x32xf32>
    %cst_41 = arith.constant 1.000000e+00 : f32
    %90 = vector.broadcast %cst_41 : f32 to vector<8x32xf32>
    %91 = arith.addf %90, %89 : vector<8x32xf32>
    %92 = arith.divf %90, %91 : vector<8x32xf32>
    %93 = math.tanh %78 : vector<8x32xf32>
    %94 = arith.negf %82 : vector<8x32xf32>
    %95 = math.exp %94 : vector<8x32xf32>
    %cst_42 = arith.constant 1.000000e+00 : f32
    %96 = vector.broadcast %cst_42 : f32 to vector<8x32xf32>
    %97 = arith.addf %96, %95 : vector<8x32xf32>
    %98 = arith.divf %96, %97 : vector<8x32xf32>
    %99 = arith.mulf %92, %65 : vector<8x32xf32>
    %100 = arith.mulf %87, %93 : vector<8x32xf32>
    %101 = arith.addf %99, %100 : vector<8x32xf32>
    %102 = math.tanh %101 : vector<8x32xf32>
    %103 = arith.mulf %98, %102 : vector<8x32xf32>
    %c0_43 = arith.constant 0 : index
    %c0_44 = arith.constant 0 : index
    %104 = vector.load %arg8[%c0_43, %c0_44] : memref<8x32xf32, #tpu.memory_space<vmem>>, vector<8x32xf32>
    tpu.vector_store %arg8[%c0_43, %c0_44], %103 {strides = array<i32>} : memref<8x32xf32, #tpu.memory_space<vmem>>, vector<8x32xf32>,
    %c0_45 = arith.constant 0 : index
    %c0_46 = arith.constant 0 : index
    %105 = vector.load %arg9[%c0_45, %c0_46] : memref<8x32xf32, #tpu.memory_space<vmem>>, vector<8x32xf32>
    tpu.vector_store %arg9[%c0_45, %c0_46], %101 {strides = array<i32>} : memref<8x32xf32, #tpu.memory_space<vmem>>, vector<8x32xf32>,
    %106 = arith.truncf %103 : vector<8x32xf32> to vector<8x32xbf16>
    %107 = arith.index_cast %c1_i32 : i32 to index
    %c0_47 = arith.constant 0 : index
    %c0_48 = arith.constant 0 : index
    %108 = vector.load %arg5[%107, %c0_47, %c0_48] : memref<8x8x32xbf16, #tpu.memory_space<vmem>>, vector<1x8x32xbf16>
    %109 = vector.shape_cast %108 : vector<1x8x32xbf16> to vector<8x32xbf16>
    %110 = vector.shape_cast %106 : vector<8x32xbf16> to vector<1x8x32xbf16>
    tpu.vector_store %arg5[%107, %c0_47, %c0_48], %110 {strides = array<i32>} : memref<8x8x32xbf16, #tpu.memory_space<vmem>>, vector<1x8x32xbf16>,
    %c2_i32 = arith.constant 2 : i32
    %111 = arith.index_cast %c2_i32 : i32 to index
    %c0_49 = arith.constant 0 : index
    %c0_50 = arith.constant 0 : index
    %c0_51 = arith.constant 0 : index
    %112 = vector.load %arg1[%111, %c0_49, %c0_50, %c0_51] : memref<8x4x8x32xf32, #tpu.memory_space<vmem>>, vector<1x4x8x32xf32>
    %113 = vector.shape_cast %112 : vector<1x4x8x32xf32> to vector<4x8x32xf32>
    %c0_52 = arith.constant 0 : index
    %c0_53 = arith.constant 0 : index
    %114 = vector.load %arg8[%c0_52, %c0_53] : memref<8x32xf32, #tpu.memory_space<vmem>>, vector<8x32xf32>
    %c0_54 = arith.constant 0 : index
    %c0_55 = arith.constant 0 : index
    %115 = vector.load %arg9[%c0_54, %c0_55] : memref<8x32xf32, #tpu.memory_space<vmem>>, vector<8x32xf32>
    %116 = arith.truncf %114 : vector<8x32xf32> to vector<8x32xbf16>
    %117 = vector.extract_strided_slice %113 {offsets = [0, 0, 0], sizes = [1, 8, 32], strides = [1, 1, 1]} : vector<4x8x32xf32> to vector<1x8x32xf32>
    %118 = vector.shape_cast %117 : vector<1x8x32xf32> to vector<8x32xf32>
    %cst_56 = arith.constant dense<0.000000e+00> : vector<8x32xf32>
    %119 = tpu.matmul %116, %4, %cst_56 {dimension_numbers = #tpu.dot_dimension_numbers<[1], [0], [0], [1], [0, 0, 1, 1], [], []>} : vector<8x32xbf16>, vector<32x32xbf16>, vector<8x32xf32> -> vector<8x32xf32>
    %120 = arith.addf %118, %119 : vector<8x32xf32>
    %121 = vector.extract_strided_slice %113 {offsets = [1, 0, 0], sizes = [1, 8, 32], strides = [1, 1, 1]} : vector<4x8x32xf32> to vector<1x8x32xf32>
    %122 = vector.shape_cast %121 : vector<1x8x32xf32> to vector<8x32xf32>
    %cst_57 = arith.constant dense<0.000000e+00> : vector<8x32xf32>
    %123 = tpu.matmul %116, %6, %cst_57 {dimension_numbers = #tpu.dot_dimension_numbers<[1], [0], [0], [1], [0, 0, 1, 1], [], []>} : vector<8x32xbf16>, vector<32x32xbf16>, vector<8x32xf32> -> vector<8x32xf32>
    %124 = arith.addf %122, %123 : vector<8x32xf32>
    %125 = vector.extract_strided_slice %113 {offsets = [2, 0, 0], sizes = [1, 8, 32], strides = [1, 1, 1]} : vector<4x8x32xf32> to vector<1x8x32xf32>
    %126 = vector.shape_cast %125 : vector<1x8x32xf32> to vector<8x32xf32>
    %cst_58 = arith.constant dense<0.000000e+00> : vector<8x32xf32>
    %127 = tpu.matmul %116, %8, %cst_58 {dimension_numbers = #tpu.dot_dimension_numbers<[1], [0], [0], [1], [0, 0, 1, 1], [], []>} : vector<8x32xbf16>, vector<32x32xbf16>, vector<8x32xf32> -> vector<8x32xf32>
    %128 = arith.addf %126, %127 : vector<8x32xf32>
    %129 = vector.extract_strided_slice %113 {offsets = [3, 0, 0], sizes = [1, 8, 32], strides = [1, 1, 1]} : vector<4x8x32xf32> to vector<1x8x32xf32>
    %130 = vector.shape_cast %129 : vector<1x8x32xf32> to vector<8x32xf32>
    %cst_59 = arith.constant dense<0.000000e+00> : vector<8x32xf32>
    %131 = tpu.matmul %116, %10, %cst_59 {dimension_numbers = #tpu.dot_dimension_numbers<[1], [0], [0], [1], [0, 0, 1, 1], [], []>} : vector<8x32xbf16>, vector<32x32xbf16>, vector<8x32xf32> -> vector<8x32xf32>
    %132 = arith.addf %130, %131 : vector<8x32xf32>
    %133 = arith.negf %120 : vector<8x32xf32>
    %134 = math.exp %133 : vector<8x32xf32>
    %cst_60 = arith.constant 1.000000e+00 : f32
    %135 = vector.broadcast %cst_60 : f32 to vector<8x32xf32>
    %136 = arith.addf %135, %134 : vector<8x32xf32>
    %137 = arith.divf %135, %136 : vector<8x32xf32>
    %138 = arith.negf %124 : vector<8x32xf32>
    %139 = math.exp %138 : vector<8x32xf32>
    %cst_61 = arith.constant 1.000000e+00 : f32
    %140 = vector.broadcast %cst_61 : f32 to vector<8x32xf32>
    %141 = arith.addf %140, %139 : vector<8x32xf32>
    %142 = arith.divf %140, %141 : vector<8x32xf32>
    %143 = math.tanh %128 : vector<8x32xf32>
    %144 = arith.negf %132 : vector<8x32xf32>
    %145 = math.exp %144 : vector<8x32xf32>
    %cst_62 = arith.constant 1.000000e+00 : f32
    %146 = vector.broadcast %cst_62 : f32 to vector<8x32xf32>
    %147 = arith.addf %146, %145 : vector<8x32xf32>
    %148 = arith.divf %146, %147 : vector<8x32xf32>
    %149 = arith.mulf %142, %115 : vector<8x32xf32>
    %150 = arith.mulf %137, %143 : vector<8x32xf32>
    %151 = arith.addf %149, %150 : vector<8x32xf32>
    %152 = math.tanh %151 : vector<8x32xf32>
    %153 = arith.mulf %148, %152 : vector<8x32xf32>
    %c0_63 = arith.constant 0 : index
    %c0_64 = arith.constant 0 : index
    %154 = vector.load %arg8[%c0_63, %c0_64] : memref<8x32xf32, #tpu.memory_space<vmem>>, vector<8x32xf32>
    tpu.vector_store %arg8[%c0_63, %c0_64], %153 {strides = array<i32>} : memref<8x32xf32, #tpu.memory_space<vmem>>, vector<8x32xf32>,
    %c0_65 = arith.constant 0 : index
    %c0_66 = arith.constant 0 : index
    %155 = vector.load %arg9[%c0_65, %c0_66] : memref<8x32xf32, #tpu.memory_space<vmem>>, vector<8x32xf32>
    tpu.vector_store %arg9[%c0_65, %c0_66], %151 {strides = array<i32>} : memref<8x32xf32, #tpu.memory_space<vmem>>, vector<8x32xf32>,
    %156 = arith.truncf %153 : vector<8x32xf32> to vector<8x32xbf16>
    %157 = arith.index_cast %c2_i32 : i32 to index
    %c0_67 = arith.constant 0 : index
    %c0_68 = arith.constant 0 : index
    %158 = vector.load %arg5[%157, %c0_67, %c0_68] : memref<8x8x32xbf16, #tpu.memory_space<vmem>>, vector<1x8x32xbf16>
    %159 = vector.shape_cast %158 : vector<1x8x32xbf16> to vector<8x32xbf16>
    %160 = vector.shape_cast %156 : vector<8x32xbf16> to vector<1x8x32xbf16>
    tpu.vector_store %arg5[%157, %c0_67, %c0_68], %160 {strides = array<i32>} : memref<8x8x32xbf16, #tpu.memory_space<vmem>>, vector<1x8x32xbf16>,
    %c3_i32 = arith.constant 3 : i32
    %161 = arith.index_cast %c3_i32 : i32 to index
    %c0_69 = arith.constant 0 : index
    %c0_70 = arith.constant 0 : index
    %c0_71 = arith.constant 0 : index
    %162 = vector.load %arg1[%161, %c0_69, %c0_70, %c0_71] : memref<8x4x8x32xf32, #tpu.memory_space<vmem>>, vector<1x4x8x32xf32>
    %163 = vector.shape_cast %162 : vector<1x4x8x32xf32> to vector<4x8x32xf32>
    %c0_72 = arith.constant 0 : index
    %c0_73 = arith.constant 0 : index
    %164 = vector.load %arg8[%c0_72, %c0_73] : memref<8x32xf32, #tpu.memory_space<vmem>>, vector<8x32xf32>
    %c0_74 = arith.constant 0 : index
    %c0_75 = arith.constant 0 : index
    %165 = vector.load %arg9[%c0_74, %c0_75] : memref<8x32xf32, #tpu.memory_space<vmem>>, vector<8x32xf32>
    %166 = arith.truncf %164 : vector<8x32xf32> to vector<8x32xbf16>
    %167 = vector.extract_strided_slice %163 {offsets = [0, 0, 0], sizes = [1, 8, 32], strides = [1, 1, 1]} : vector<4x8x32xf32> to vector<1x8x32xf32>
    %168 = vector.shape_cast %167 : vector<1x8x32xf32> to vector<8x32xf32>
    %cst_76 = arith.constant dense<0.000000e+00> : vector<8x32xf32>
    %169 = tpu.matmul %166, %4, %cst_76 {dimension_numbers = #tpu.dot_dimension_numbers<[1], [0], [0], [1], [0, 0, 1, 1], [], []>} : vector<8x32xbf16>, vector<32x32xbf16>, vector<8x32xf32> -> vector<8x32xf32>
    %170 = arith.addf %168, %169 : vector<8x32xf32>
    %171 = vector.extract_strided_slice %163 {offsets = [1, 0, 0], sizes = [1, 8, 32], strides = [1, 1, 1]} : vector<4x8x32xf32> to vector<1x8x32xf32>
    %172 = vector.shape_cast %171 : vector<1x8x32xf32> to vector<8x32xf32>
    %cst_77 = arith.constant dense<0.000000e+00> : vector<8x32xf32>
    %173 = tpu.matmul %166, %6, %cst_77 {dimension_numbers = #tpu.dot_dimension_numbers<[1], [0], [0], [1], [0, 0, 1, 1], [], []>} : vector<8x32xbf16>, vector<32x32xbf16>, vector<8x32xf32> -> vector<8x32xf32>
    %174 = arith.addf %172, %173 : vector<8x32xf32>
    %175 = vector.extract_strided_slice %163 {offsets = [2, 0, 0], sizes = [1, 8, 32], strides = [1, 1, 1]} : vector<4x8x32xf32> to vector<1x8x32xf32>
    %176 = vector.shape_cast %175 : vector<1x8x32xf32> to vector<8x32xf32>
    %cst_78 = arith.constant dense<0.000000e+00> : vector<8x32xf32>
    %177 = tpu.matmul %166, %8, %cst_78 {dimension_numbers = #tpu.dot_dimension_numbers<[1], [0], [0], [1], [0, 0, 1, 1], [], []>} : vector<8x32xbf16>, vector<32x32xbf16>, vector<8x32xf32> -> vector<8x32xf32>
    %178 = arith.addf %176, %177 : vector<8x32xf32>
    %179 = vector.extract_strided_slice %163 {offsets = [3, 0, 0], sizes = [1, 8, 32], strides = [1, 1, 1]} : vector<4x8x32xf32> to vector<1x8x32xf32>
    %180 = vector.shape_cast %179 : vector<1x8x32xf32> to vector<8x32xf32>
    %cst_79 = arith.constant dense<0.000000e+00> : vector<8x32xf32>
    %181 = tpu.matmul %166, %10, %cst_79 {dimension_numbers = #tpu.dot_dimension_numbers<[1], [0], [0], [1], [0, 0, 1, 1], [], []>} : vector<8x32xbf16>, vector<32x32xbf16>, vector<8x32xf32> -> vector<8x32xf32>
    %182 = arith.addf %180, %181 : vector<8x32xf32>
    %183 = arith.negf %170 : vector<8x32xf32>
    %184 = math.exp %183 : vector<8x32xf32>
    %cst_80 = arith.constant 1.000000e+00 : f32
    %185 = vector.broadcast %cst_80 : f32 to vector<8x32xf32>
    %186 = arith.addf %185, %184 : vector<8x32xf32>
    %187 = arith.divf %185, %186 : vector<8x32xf32>
    %188 = arith.negf %174 : vector<8x32xf32>
    %189 = math.exp %188 : vector<8x32xf32>
    %cst_81 = arith.constant 1.000000e+00 : f32
    %190 = vector.broadcast %cst_81 : f32 to vector<8x32xf32>
    %191 = arith.addf %190, %189 : vector<8x32xf32>
    %192 = arith.divf %190, %191 : vector<8x32xf32>
    %193 = math.tanh %178 : vector<8x32xf32>
    %194 = arith.negf %182 : vector<8x32xf32>
    %195 = math.exp %194 : vector<8x32xf32>
    %cst_82 = arith.constant 1.000000e+00 : f32
    %196 = vector.broadcast %cst_82 : f32 to vector<8x32xf32>
    %197 = arith.addf %196, %195 : vector<8x32xf32>
    %198 = arith.divf %196, %197 : vector<8x32xf32>
    %199 = arith.mulf %192, %165 : vector<8x32xf32>
    %200 = arith.mulf %187, %193 : vector<8x32xf32>
    %201 = arith.addf %199, %200 : vector<8x32xf32>
    %202 = math.tanh %201 : vector<8x32xf32>
    %203 = arith.mulf %198, %202 : vector<8x32xf32>
    %c0_83 = arith.constant 0 : index
    %c0_84 = arith.constant 0 : index
    %204 = vector.load %arg8[%c0_83, %c0_84] : memref<8x32xf32, #tpu.memory_space<vmem>>, vector<8x32xf32>
    tpu.vector_store %arg8[%c0_83, %c0_84], %203 {strides = array<i32>} : memref<8x32xf32, #tpu.memory_space<vmem>>, vector<8x32xf32>,
    %c0_85 = arith.constant 0 : index
    %c0_86 = arith.constant 0 : index
    %205 = vector.load %arg9[%c0_85, %c0_86] : memref<8x32xf32, #tpu.memory_space<vmem>>, vector<8x32xf32>
    tpu.vector_store %arg9[%c0_85, %c0_86], %201 {strides = array<i32>} : memref<8x32xf32, #tpu.memory_space<vmem>>, vector<8x32xf32>,
    %206 = arith.truncf %203 : vector<8x32xf32> to vector<8x32xbf16>
    %207 = arith.index_cast %c3_i32 : i32 to index
    %c0_87 = arith.constant 0 : index
    %c0_88 = arith.constant 0 : index
    %208 = vector.load %arg5[%207, %c0_87, %c0_88] : memref<8x8x32xbf16, #tpu.memory_space<vmem>>, vector<1x8x32xbf16>
    %209 = vector.shape_cast %208 : vector<1x8x32xbf16> to vector<8x32xbf16>
    %210 = vector.shape_cast %206 : vector<8x32xbf16> to vector<1x8x32xbf16>
    tpu.vector_store %arg5[%207, %c0_87, %c0_88], %210 {strides = array<i32>} : memref<8x8x32xbf16, #tpu.memory_space<vmem>>, vector<1x8x32xbf16>,
    %c4_i32 = arith.constant 4 : i32
    %211 = arith.index_cast %c4_i32 : i32 to index
    %c0_89 = arith.constant 0 : index
    %c0_90 = arith.constant 0 : index
    %c0_91 = arith.constant 0 : index
    %212 = vector.load %arg1[%211, %c0_89, %c0_90, %c0_91] : memref<8x4x8x32xf32, #tpu.memory_space<vmem>>, vector<1x4x8x32xf32>
    %213 = vector.shape_cast %212 : vector<1x4x8x32xf32> to vector<4x8x32xf32>
    %c0_92 = arith.constant 0 : index
    %c0_93 = arith.constant 0 : index
    %214 = vector.load %arg8[%c0_92, %c0_93] : memref<8x32xf32, #tpu.memory_space<vmem>>, vector<8x32xf32>
    %c0_94 = arith.constant 0 : index
    %c0_95 = arith.constant 0 : index
    %215 = vector.load %arg9[%c0_94, %c0_95] : memref<8x32xf32, #tpu.memory_space<vmem>>, vector<8x32xf32>
    %216 = arith.truncf %214 : vector<8x32xf32> to vector<8x32xbf16>
    %217 = vector.extract_strided_slice %213 {offsets = [0, 0, 0], sizes = [1, 8, 32], strides = [1, 1, 1]} : vector<4x8x32xf32> to vector<1x8x32xf32>
    %218 = vector.shape_cast %217 : vector<1x8x32xf32> to vector<8x32xf32>
    %cst_96 = arith.constant dense<0.000000e+00> : vector<8x32xf32>
    %219 = tpu.matmul %216, %4, %cst_96 {dimension_numbers = #tpu.dot_dimension_numbers<[1], [0], [0], [1], [0, 0, 1, 1], [], []>} : vector<8x32xbf16>, vector<32x32xbf16>, vector<8x32xf32> -> vector<8x32xf32>
    %220 = arith.addf %218, %219 : vector<8x32xf32>
    %221 = vector.extract_strided_slice %213 {offsets = [1, 0, 0], sizes = [1, 8, 32], strides = [1, 1, 1]} : vector<4x8x32xf32> to vector<1x8x32xf32>
    %222 = vector.shape_cast %221 : vector<1x8x32xf32> to vector<8x32xf32>
    %cst_97 = arith.constant dense<0.000000e+00> : vector<8x32xf32>
    %223 = tpu.matmul %216, %6, %cst_97 {dimension_numbers = #tpu.dot_dimension_numbers<[1], [0], [0], [1], [0, 0, 1, 1], [], []>} : vector<8x32xbf16>, vector<32x32xbf16>, vector<8x32xf32> -> vector<8x32xf32>
    %224 = arith.addf %222, %223 : vector<8x32xf32>
    %225 = vector.extract_strided_slice %213 {offsets = [2, 0, 0], sizes = [1, 8, 32], strides = [1, 1, 1]} : vector<4x8x32xf32> to vector<1x8x32xf32>
    %226 = vector.shape_cast %225 : vector<1x8x32xf32> to vector<8x32xf32>
    %cst_98 = arith.constant dense<0.000000e+00> : vector<8x32xf32>
    %227 = tpu.matmul %216, %8, %cst_98 {dimension_numbers = #tpu.dot_dimension_numbers<[1], [0], [0], [1], [0, 0, 1, 1], [], []>} : vector<8x32xbf16>, vector<32x32xbf16>, vector<8x32xf32> -> vector<8x32xf32>
    %228 = arith.addf %226, %227 : vector<8x32xf32>
    %229 = vector.extract_strided_slice %213 {offsets = [3, 0, 0], sizes = [1, 8, 32], strides = [1, 1, 1]} : vector<4x8x32xf32> to vector<1x8x32xf32>
    %230 = vector.shape_cast %229 : vector<1x8x32xf32> to vector<8x32xf32>
    %cst_99 = arith.constant dense<0.000000e+00> : vector<8x32xf32>
    %231 = tpu.matmul %216, %10, %cst_99 {dimension_numbers = #tpu.dot_dimension_numbers<[1], [0], [0], [1], [0, 0, 1, 1], [], []>} : vector<8x32xbf16>, vector<32x32xbf16>, vector<8x32xf32> -> vector<8x32xf32>
    %232 = arith.addf %230, %231 : vector<8x32xf32>
    %233 = arith.negf %220 : vector<8x32xf32>
    %234 = math.exp %233 : vector<8x32xf32>
    %cst_100 = arith.constant 1.000000e+00 : f32
    %235 = vector.broadcast %cst_100 : f32 to vector<8x32xf32>
    %236 = arith.addf %235, %234 : vector<8x32xf32>
    %237 = arith.divf %235, %236 : vector<8x32xf32>
    %238 = arith.negf %224 : vector<8x32xf32>
    %239 = math.exp %238 : vector<8x32xf32>
    %cst_101 = arith.constant 1.000000e+00 : f32
    %240 = vector.broadcast %cst_101 : f32 to vector<8x32xf32>
    %241 = arith.addf %240, %239 : vector<8x32xf32>
    %242 = arith.divf %240, %241 : vector<8x32xf32>
    %243 = math.tanh %228 : vector<8x32xf32>
    %244 = arith.negf %232 : vector<8x32xf32>
    %245 = math.exp %244 : vector<8x32xf32>
    %cst_102 = arith.constant 1.000000e+00 : f32
    %246 = vector.broadcast %cst_102 : f32 to vector<8x32xf32>
    %247 = arith.addf %246, %245 : vector<8x32xf32>
    %248 = arith.divf %246, %247 : vector<8x32xf32>
    %249 = arith.mulf %242, %215 : vector<8x32xf32>
    %250 = arith.mulf %237, %243 : vector<8x32xf32>
    %251 = arith.addf %249, %250 : vector<8x32xf32>
    %252 = math.tanh %251 : vector<8x32xf32>
    %253 = arith.mulf %248, %252 : vector<8x32xf32>
    %c0_103 = arith.constant 0 : index
    %c0_104 = arith.constant 0 : index
    %254 = vector.load %arg8[%c0_103, %c0_104] : memref<8x32xf32, #tpu.memory_space<vmem>>, vector<8x32xf32>
    tpu.vector_store %arg8[%c0_103, %c0_104], %253 {strides = array<i32>} : memref<8x32xf32, #tpu.memory_space<vmem>>, vector<8x32xf32>,
    %c0_105 = arith.constant 0 : index
    %c0_106 = arith.constant 0 : index
    %255 = vector.load %arg9[%c0_105, %c0_106] : memref<8x32xf32, #tpu.memory_space<vmem>>, vector<8x32xf32>
    tpu.vector_store %arg9[%c0_105, %c0_106], %251 {strides = array<i32>} : memref<8x32xf32, #tpu.memory_space<vmem>>, vector<8x32xf32>,
    %256 = arith.truncf %253 : vector<8x32xf32> to vector<8x32xbf16>
    %257 = arith.index_cast %c4_i32 : i32 to index
    %c0_107 = arith.constant 0 : index
    %c0_108 = arith.constant 0 : index
    %258 = vector.load %arg5[%257, %c0_107, %c0_108] : memref<8x8x32xbf16, #tpu.memory_space<vmem>>, vector<1x8x32xbf16>
    %259 = vector.shape_cast %258 : vector<1x8x32xbf16> to vector<8x32xbf16>
    %260 = vector.shape_cast %256 : vector<8x32xbf16> to vector<1x8x32xbf16>
    tpu.vector_store %arg5[%257, %c0_107, %c0_108], %260 {strides = array<i32>} : memref<8x8x32xbf16, #tpu.memory_space<vmem>>, vector<1x8x32xbf16>,
    %c5_i32 = arith.constant 5 : i32
    %261 = arith.index_cast %c5_i32 : i32 to index
    %c0_109 = arith.constant 0 : index
    %c0_110 = arith.constant 0 : index
    %c0_111 = arith.constant 0 : index
    %262 = vector.load %arg1[%261, %c0_109, %c0_110, %c0_111] : memref<8x4x8x32xf32, #tpu.memory_space<vmem>>, vector<1x4x8x32xf32>
    %263 = vector.shape_cast %262 : vector<1x4x8x32xf32> to vector<4x8x32xf32>
    %c0_112 = arith.constant 0 : index
    %c0_113 = arith.constant 0 : index
    %264 = vector.load %arg8[%c0_112, %c0_113] : memref<8x32xf32, #tpu.memory_space<vmem>>, vector<8x32xf32>
    %c0_114 = arith.constant 0 : index
    %c0_115 = arith.constant 0 : index
    %265 = vector.load %arg9[%c0_114, %c0_115] : memref<8x32xf32, #tpu.memory_space<vmem>>, vector<8x32xf32>
    %266 = arith.truncf %264 : vector<8x32xf32> to vector<8x32xbf16>
    %267 = vector.extract_strided_slice %263 {offsets = [0, 0, 0], sizes = [1, 8, 32], strides = [1, 1, 1]} : vector<4x8x32xf32> to vector<1x8x32xf32>
    %268 = vector.shape_cast %267 : vector<1x8x32xf32> to vector<8x32xf32>
    %cst_116 = arith.constant dense<0.000000e+00> : vector<8x32xf32>
    %269 = tpu.matmul %266, %4, %cst_116 {dimension_numbers = #tpu.dot_dimension_numbers<[1], [0], [0], [1], [0, 0, 1, 1], [], []>} : vector<8x32xbf16>, vector<32x32xbf16>, vector<8x32xf32> -> vector<8x32xf32>
    %270 = arith.addf %268, %269 : vector<8x32xf32>
    %271 = vector.extract_strided_slice %263 {offsets = [1, 0, 0], sizes = [1, 8, 32], strides = [1, 1, 1]} : vector<4x8x32xf32> to vector<1x8x32xf32>
    %272 = vector.shape_cast %271 : vector<1x8x32xf32> to vector<8x32xf32>
    %cst_117 = arith.constant dense<0.000000e+00> : vector<8x32xf32>
    %273 = tpu.matmul %266, %6, %cst_117 {dimension_numbers = #tpu.dot_dimension_numbers<[1], [0], [0], [1], [0, 0, 1, 1], [], []>} : vector<8x32xbf16>, vector<32x32xbf16>, vector<8x32xf32> -> vector<8x32xf32>
    %274 = arith.addf %272, %273 : vector<8x32xf32>
    %275 = vector.extract_strided_slice %263 {offsets = [2, 0, 0], sizes = [1, 8, 32], strides = [1, 1, 1]} : vector<4x8x32xf32> to vector<1x8x32xf32>
    %276 = vector.shape_cast %275 : vector<1x8x32xf32> to vector<8x32xf32>
    %cst_118 = arith.constant dense<0.000000e+00> : vector<8x32xf32>
    %277 = tpu.matmul %266, %8, %cst_118 {dimension_numbers = #tpu.dot_dimension_numbers<[1], [0], [0], [1], [0, 0, 1, 1], [], []>} : vector<8x32xbf16>, vector<32x32xbf16>, vector<8x32xf32> -> vector<8x32xf32>
    %278 = arith.addf %276, %277 : vector<8x32xf32>
    %279 = vector.extract_strided_slice %263 {offsets = [3, 0, 0], sizes = [1, 8, 32], strides = [1, 1, 1]} : vector<4x8x32xf32> to vector<1x8x32xf32>
    %280 = vector.shape_cast %279 : vector<1x8x32xf32> to vector<8x32xf32>
    %cst_119 = arith.constant dense<0.000000e+00> : vector<8x32xf32>
    %281 = tpu.matmul %266, %10, %cst_119 {dimension_numbers = #tpu.dot_dimension_numbers<[1], [0], [0], [1], [0, 0, 1, 1], [], []>} : vector<8x32xbf16>, vector<32x32xbf16>, vector<8x32xf32> -> vector<8x32xf32>
    %282 = arith.addf %280, %281 : vector<8x32xf32>
    %283 = arith.negf %270 : vector<8x32xf32>
    %284 = math.exp %283 : vector<8x32xf32>
    %cst_120 = arith.constant 1.000000e+00 : f32
    %285 = vector.broadcast %cst_120 : f32 to vector<8x32xf32>
    %286 = arith.addf %285, %284 : vector<8x32xf32>
    %287 = arith.divf %285, %286 : vector<8x32xf32>
    %288 = arith.negf %274 : vector<8x32xf32>
    %289 = math.exp %288 : vector<8x32xf32>
    %cst_121 = arith.constant 1.000000e+00 : f32
    %290 = vector.broadcast %cst_121 : f32 to vector<8x32xf32>
    %291 = arith.addf %290, %289 : vector<8x32xf32>
    %292 = arith.divf %290, %291 : vector<8x32xf32>
    %293 = math.tanh %278 : vector<8x32xf32>
    %294 = arith.negf %282 : vector<8x32xf32>
    %295 = math.exp %294 : vector<8x32xf32>
    %cst_122 = arith.constant 1.000000e+00 : f32
    %296 = vector.broadcast %cst_122 : f32 to vector<8x32xf32>
    %297 = arith.addf %296, %295 : vector<8x32xf32>
    %298 = arith.divf %296, %297 : vector<8x32xf32>
    %299 = arith.mulf %292, %265 : vector<8x32xf32>
    %300 = arith.mulf %287, %293 : vector<8x32xf32>
    %301 = arith.addf %299, %300 : vector<8x32xf32>
    %302 = math.tanh %301 : vector<8x32xf32>
    %303 = arith.mulf %298, %302 : vector<8x32xf32>
    %c0_123 = arith.constant 0 : index
    %c0_124 = arith.constant 0 : index
    %304 = vector.load %arg8[%c0_123, %c0_124] : memref<8x32xf32, #tpu.memory_space<vmem>>, vector<8x32xf32>
    tpu.vector_store %arg8[%c0_123, %c0_124], %303 {strides = array<i32>} : memref<8x32xf32, #tpu.memory_space<vmem>>, vector<8x32xf32>,
    %c0_125 = arith.constant 0 : index
    %c0_126 = arith.constant 0 : index
    %305 = vector.load %arg9[%c0_125, %c0_126] : memref<8x32xf32, #tpu.memory_space<vmem>>, vector<8x32xf32>
    tpu.vector_store %arg9[%c0_125, %c0_126], %301 {strides = array<i32>} : memref<8x32xf32, #tpu.memory_space<vmem>>, vector<8x32xf32>,
    %306 = arith.truncf %303 : vector<8x32xf32> to vector<8x32xbf16>
    %307 = arith.index_cast %c5_i32 : i32 to index
    %c0_127 = arith.constant 0 : index
    %c0_128 = arith.constant 0 : index
    %308 = vector.load %arg5[%307, %c0_127, %c0_128] : memref<8x8x32xbf16, #tpu.memory_space<vmem>>, vector<1x8x32xbf16>
    %309 = vector.shape_cast %308 : vector<1x8x32xbf16> to vector<8x32xbf16>
    %310 = vector.shape_cast %306 : vector<8x32xbf16> to vector<1x8x32xbf16>
    tpu.vector_store %arg5[%307, %c0_127, %c0_128], %310 {strides = array<i32>} : memref<8x8x32xbf16, #tpu.memory_space<vmem>>, vector<1x8x32xbf16>,
    %c6_i32 = arith.constant 6 : i32
    %311 = arith.index_cast %c6_i32 : i32 to index
    %c0_129 = arith.constant 0 : index
    %c0_130 = arith.constant 0 : index
    %c0_131 = arith.constant 0 : index
    %312 = vector.load %arg1[%311, %c0_129, %c0_130, %c0_131] : memref<8x4x8x32xf32, #tpu.memory_space<vmem>>, vector<1x4x8x32xf32>
    %313 = vector.shape_cast %312 : vector<1x4x8x32xf32> to vector<4x8x32xf32>
    %c0_132 = arith.constant 0 : index
    %c0_133 = arith.constant 0 : index
    %314 = vector.load %arg8[%c0_132, %c0_133] : memref<8x32xf32, #tpu.memory_space<vmem>>, vector<8x32xf32>
    %c0_134 = arith.constant 0 : index
    %c0_135 = arith.constant 0 : index
    %315 = vector.load %arg9[%c0_134, %c0_135] : memref<8x32xf32, #tpu.memory_space<vmem>>, vector<8x32xf32>
    %316 = arith.truncf %314 : vector<8x32xf32> to vector<8x32xbf16>
    %317 = vector.extract_strided_slice %313 {offsets = [0, 0, 0], sizes = [1, 8, 32], strides = [1, 1, 1]} : vector<4x8x32xf32> to vector<1x8x32xf32>
    %318 = vector.shape_cast %317 : vector<1x8x32xf32> to vector<8x32xf32>
    %cst_136 = arith.constant dense<0.000000e+00> : vector<8x32xf32>
    %319 = tpu.matmul %316, %4, %cst_136 {dimension_numbers = #tpu.dot_dimension_numbers<[1], [0], [0], [1], [0, 0, 1, 1], [], []>} : vector<8x32xbf16>, vector<32x32xbf16>, vector<8x32xf32> -> vector<8x32xf32>
    %320 = arith.addf %318, %319 : vector<8x32xf32>
    %321 = vector.extract_strided_slice %313 {offsets = [1, 0, 0], sizes = [1, 8, 32], strides = [1, 1, 1]} : vector<4x8x32xf32> to vector<1x8x32xf32>
    %322 = vector.shape_cast %321 : vector<1x8x32xf32> to vector<8x32xf32>
    %cst_137 = arith.constant dense<0.000000e+00> : vector<8x32xf32>
    %323 = tpu.matmul %316, %6, %cst_137 {dimension_numbers = #tpu.dot_dimension_numbers<[1], [0], [0], [1], [0, 0, 1, 1], [], []>} : vector<8x32xbf16>, vector<32x32xbf16>, vector<8x32xf32> -> vector<8x32xf32>
    %324 = arith.addf %322, %323 : vector<8x32xf32>
    %325 = vector.extract_strided_slice %313 {offsets = [2, 0, 0], sizes = [1, 8, 32], strides = [1, 1, 1]} : vector<4x8x32xf32> to vector<1x8x32xf32>
    %326 = vector.shape_cast %325 : vector<1x8x32xf32> to vector<8x32xf32>
    %cst_138 = arith.constant dense<0.000000e+00> : vector<8x32xf32>
    %327 = tpu.matmul %316, %8, %cst_138 {dimension_numbers = #tpu.dot_dimension_numbers<[1], [0], [0], [1], [0, 0, 1, 1], [], []>} : vector<8x32xbf16>, vector<32x32xbf16>, vector<8x32xf32> -> vector<8x32xf32>
    %328 = arith.addf %326, %327 : vector<8x32xf32>
    %329 = vector.extract_strided_slice %313 {offsets = [3, 0, 0], sizes = [1, 8, 32], strides = [1, 1, 1]} : vector<4x8x32xf32> to vector<1x8x32xf32>
    %330 = vector.shape_cast %329 : vector<1x8x32xf32> to vector<8x32xf32>
    %cst_139 = arith.constant dense<0.000000e+00> : vector<8x32xf32>
    %331 = tpu.matmul %316, %10, %cst_139 {dimension_numbers = #tpu.dot_dimension_numbers<[1], [0], [0], [1], [0, 0, 1, 1], [], []>} : vector<8x32xbf16>, vector<32x32xbf16>, vector<8x32xf32> -> vector<8x32xf32>
    %332 = arith.addf %330, %331 : vector<8x32xf32>
    %333 = arith.negf %320 : vector<8x32xf32>
    %334 = math.exp %333 : vector<8x32xf32>
    %cst_140 = arith.constant 1.000000e+00 : f32
    %335 = vector.broadcast %cst_140 : f32 to vector<8x32xf32>
    %336 = arith.addf %335, %334 : vector<8x32xf32>
    %337 = arith.divf %335, %336 : vector<8x32xf32>
    %338 = arith.negf %324 : vector<8x32xf32>
    %339 = math.exp %338 : vector<8x32xf32>
    %cst_141 = arith.constant 1.000000e+00 : f32
    %340 = vector.broadcast %cst_141 : f32 to vector<8x32xf32>
    %341 = arith.addf %340, %339 : vector<8x32xf32>
    %342 = arith.divf %340, %341 : vector<8x32xf32>
    %343 = math.tanh %328 : vector<8x32xf32>
    %344 = arith.negf %332 : vector<8x32xf32>
    %345 = math.exp %344 : vector<8x32xf32>
    %cst_142 = arith.constant 1.000000e+00 : f32
    %346 = vector.broadcast %cst_142 : f32 to vector<8x32xf32>
    %347 = arith.addf %346, %345 : vector<8x32xf32>
    %348 = arith.divf %346, %347 : vector<8x32xf32>
    %349 = arith.mulf %342, %315 : vector<8x32xf32>
    %350 = arith.mulf %337, %343 : vector<8x32xf32>
    %351 = arith.addf %349, %350 : vector<8x32xf32>
    %352 = math.tanh %351 : vector<8x32xf32>
    %353 = arith.mulf %348, %352 : vector<8x32xf32>
    %c0_143 = arith.constant 0 : index
    %c0_144 = arith.constant 0 : index
    %354 = vector.load %arg8[%c0_143, %c0_144] : memref<8x32xf32, #tpu.memory_space<vmem>>, vector<8x32xf32>
    tpu.vector_store %arg8[%c0_143, %c0_144], %353 {strides = array<i32>} : memref<8x32xf32, #tpu.memory_space<vmem>>, vector<8x32xf32>,
    %c0_145 = arith.constant 0 : index
    %c0_146 = arith.constant 0 : index
    %355 = vector.load %arg9[%c0_145, %c0_146] : memref<8x32xf32, #tpu.memory_space<vmem>>, vector<8x32xf32>
    tpu.vector_store %arg9[%c0_145, %c0_146], %351 {strides = array<i32>} : memref<8x32xf32, #tpu.memory_space<vmem>>, vector<8x32xf32>,
    %356 = arith.truncf %353 : vector<8x32xf32> to vector<8x32xbf16>
    %357 = arith.index_cast %c6_i32 : i32 to index
    %c0_147 = arith.constant 0 : index
    %c0_148 = arith.constant 0 : index
    %358 = vector.load %arg5[%357, %c0_147, %c0_148] : memref<8x8x32xbf16, #tpu.memory_space<vmem>>, vector<1x8x32xbf16>
    %359 = vector.shape_cast %358 : vector<1x8x32xbf16> to vector<8x32xbf16>
    %360 = vector.shape_cast %356 : vector<8x32xbf16> to vector<1x8x32xbf16>
    tpu.vector_store %arg5[%357, %c0_147, %c0_148], %360 {strides = array<i32>} : memref<8x8x32xbf16, #tpu.memory_space<vmem>>, vector<1x8x32xbf16>,
    %c7_i32 = arith.constant 7 : i32
    %361 = arith.index_cast %c7_i32 : i32 to index
    %c0_149 = arith.constant 0 : index
    %c0_150 = arith.constant 0 : index
    %c0_151 = arith.constant 0 : index
    %362 = vector.load %arg1[%361, %c0_149, %c0_150, %c0_151] : memref<8x4x8x32xf32, #tpu.memory_space<vmem>>, vector<1x4x8x32xf32>
    %363 = vector.shape_cast %362 : vector<1x4x8x32xf32> to vector<4x8x32xf32>
    %c0_152 = arith.constant 0 : index
    %c0_153 = arith.constant 0 : index
    %364 = vector.load %arg8[%c0_152, %c0_153] : memref<8x32xf32, #tpu.memory_space<vmem>>, vector<8x32xf32>
    %c0_154 = arith.constant 0 : index
    %c0_155 = arith.constant 0 : index
    %365 = vector.load %arg9[%c0_154, %c0_155] : memref<8x32xf32, #tpu.memory_space<vmem>>, vector<8x32xf32>
    %366 = arith.truncf %364 : vector<8x32xf32> to vector<8x32xbf16>
    %367 = vector.extract_strided_slice %363 {offsets = [0, 0, 0], sizes = [1, 8, 32], strides = [1, 1, 1]} : vector<4x8x32xf32> to vector<1x8x32xf32>
    %368 = vector.shape_cast %367 : vector<1x8x32xf32> to vector<8x32xf32>
    %cst_156 = arith.constant dense<0.000000e+00> : vector<8x32xf32>
    %369 = tpu.matmul %366, %4, %cst_156 {dimension_numbers = #tpu.dot_dimension_numbers<[1], [0], [0], [1], [0, 0, 1, 1], [], []>} : vector<8x32xbf16>, vector<32x32xbf16>, vector<8x32xf32> -> vector<8x32xf32>
    %370 = arith.addf %368, %369 : vector<8x32xf32>
    %371 = vector.extract_strided_slice %363 {offsets = [1, 0, 0], sizes = [1, 8, 32], strides = [1, 1, 1]} : vector<4x8x32xf32> to vector<1x8x32xf32>
    %372 = vector.shape_cast %371 : vector<1x8x32xf32> to vector<8x32xf32>
    %cst_157 = arith.constant dense<0.000000e+00> : vector<8x32xf32>
    %373 = tpu.matmul %366, %6, %cst_157 {dimension_numbers = #tpu.dot_dimension_numbers<[1], [0], [0], [1], [0, 0, 1, 1], [], []>} : vector<8x32xbf16>, vector<32x32xbf16>, vector<8x32xf32> -> vector<8x32xf32>
    %374 = arith.addf %372, %373 : vector<8x32xf32>
    %375 = vector.extract_strided_slice %363 {offsets = [2, 0, 0], sizes = [1, 8, 32], strides = [1, 1, 1]} : vector<4x8x32xf32> to vector<1x8x32xf32>
    %376 = vector.shape_cast %375 : vector<1x8x32xf32> to vector<8x32xf32>
    %cst_158 = arith.constant dense<0.000000e+00> : vector<8x32xf32>
    %377 = tpu.matmul %366, %8, %cst_158 {dimension_numbers = #tpu.dot_dimension_numbers<[1], [0], [0], [1], [0, 0, 1, 1], [], []>} : vector<8x32xbf16>, vector<32x32xbf16>, vector<8x32xf32> -> vector<8x32xf32>
    %378 = arith.addf %376, %377 : vector<8x32xf32>
    %379 = vector.extract_strided_slice %363 {offsets = [3, 0, 0], sizes = [1, 8, 32], strides = [1, 1, 1]} : vector<4x8x32xf32> to vector<1x8x32xf32>
    %380 = vector.shape_cast %379 : vector<1x8x32xf32> to vector<8x32xf32>
    %cst_159 = arith.constant dense<0.000000e+00> : vector<8x32xf32>
    %381 = tpu.matmul %366, %10, %cst_159 {dimension_numbers = #tpu.dot_dimension_numbers<[1], [0], [0], [1], [0, 0, 1, 1], [], []>} : vector<8x32xbf16>, vector<32x32xbf16>, vector<8x32xf32> -> vector<8x32xf32>
    %382 = arith.addf %380, %381 : vector<8x32xf32>
    %383 = arith.negf %370 : vector<8x32xf32>
    %384 = math.exp %383 : vector<8x32xf32>
    %cst_160 = arith.constant 1.000000e+00 : f32
    %385 = vector.broadcast %cst_160 : f32 to vector<8x32xf32>
    %386 = arith.addf %385, %384 : vector<8x32xf32>
    %387 = arith.divf %385, %386 : vector<8x32xf32>
    %388 = arith.negf %374 : vector<8x32xf32>
    %389 = math.exp %388 : vector<8x32xf32>
    %cst_161 = arith.constant 1.000000e+00 : f32
    %390 = vector.broadcast %cst_161 : f32 to vector<8x32xf32>
    %391 = arith.addf %390, %389 : vector<8x32xf32>
    %392 = arith.divf %390, %391 : vector<8x32xf32>
    %393 = math.tanh %378 : vector<8x32xf32>
    %394 = arith.negf %382 : vector<8x32xf32>
    %395 = math.exp %394 : vector<8x32xf32>
    %cst_162 = arith.constant 1.000000e+00 : f32
    %396 = vector.broadcast %cst_162 : f32 to vector<8x32xf32>
    %397 = arith.addf %396, %395 : vector<8x32xf32>
    %398 = arith.divf %396, %397 : vector<8x32xf32>
    %399 = arith.mulf %392, %365 : vector<8x32xf32>
    %400 = arith.mulf %387, %393 : vector<8x32xf32>
    %401 = arith.addf %399, %400 : vector<8x32xf32>
    %402 = math.tanh %401 : vector<8x32xf32>
    %403 = arith.mulf %398, %402 : vector<8x32xf32>
    %c0_163 = arith.constant 0 : index
    %c0_164 = arith.constant 0 : index
    %404 = vector.load %arg8[%c0_163, %c0_164] : memref<8x32xf32, #tpu.memory_space<vmem>>, vector<8x32xf32>
    tpu.vector_store %arg8[%c0_163, %c0_164], %403 {strides = array<i32>} : memref<8x32xf32, #tpu.memory_space<vmem>>, vector<8x32xf32>,
    %c0_165 = arith.constant 0 : index
    %c0_166 = arith.constant 0 : index
    %405 = vector.load %arg9[%c0_165, %c0_166] : memref<8x32xf32, #tpu.memory_space<vmem>>, vector<8x32xf32>
    tpu.vector_store %arg9[%c0_165, %c0_166], %401 {strides = array<i32>} : memref<8x32xf32, #tpu.memory_space<vmem>>, vector<8x32xf32>,
    %406 = arith.truncf %403 : vector<8x32xf32> to vector<8x32xbf16>
    %407 = arith.index_cast %c7_i32 : i32 to index
    %c0_167 = arith.constant 0 : index
    %c0_168 = arith.constant 0 : index
    %408 = vector.load %arg5[%407, %c0_167, %c0_168] : memref<8x8x32xbf16, #tpu.memory_space<vmem>>, vector<1x8x32xbf16>
    %409 = vector.shape_cast %408 : vector<1x8x32xbf16> to vector<8x32xbf16>
    %410 = vector.shape_cast %406 : vector<8x32xbf16> to vector<1x8x32xbf16>
    tpu.vector_store %arg5[%407, %c0_167, %c0_168], %410 {strides = array<i32>} : memref<8x8x32xbf16, #tpu.memory_space<vmem>>, vector<1x8x32xbf16>,
    %c8_i32 = arith.constant 8 : i32
    %c0_i32_169 = arith.constant 0 : i32
    %411 = arith.cmpi eq, %arg0, %c0_i32_169 : i32
    %412 = arith.extui %411 : i1 to i32
    %c0_i32_170 = arith.constant 0 : i32
    %413 = arith.cmpi ne, %412, %c0_i32_170 : i32
    scf.if %413 {
      %c0_171 = arith.constant 0 : index
      %c0_172 = arith.constant 0 : index
      %414 = vector.load %arg8[%c0_171, %c0_172] : memref<8x32xf32, #tpu.memory_space<vmem>>, vector<8x32xf32>
      %c0_173 = arith.constant 0 : index
      %c0_174 = arith.constant 0 : index
      %415 = vector.load %arg6[%c0_173, %c0_174] : memref<8x32xf32, #tpu.memory_space<vmem>>, vector<8x32xf32>
      tpu.vector_store %arg6[%c0_173, %c0_174], %414 {strides = array<i32>} : memref<8x32xf32, #tpu.memory_space<vmem>>, vector<8x32xf32>,
      %c0_175 = arith.constant 0 : index
      %c0_176 = arith.constant 0 : index
      %416 = vector.load %arg9[%c0_175, %c0_176] : memref<8x32xf32, #tpu.memory_space<vmem>>, vector<8x32xf32>
      %c0_177 = arith.constant 0 : index
      %c0_178 = arith.constant 0 : index
      %417 = vector.load %arg7[%c0_177, %c0_178] : memref<8x32xf32, #tpu.memory_space<vmem>>, vector<8x32xf32>
      tpu.vector_store %arg7[%c0_177, %c0_178], %416 {strides = array<i32>} : memref<8x32xf32, #tpu.memory_space<vmem>>, vector<8x32xf32>,
    } else {
    }
    return
  }
  func.func @transform_0(%arg0: i32) -> (i32, i32, i32, i32) {
    %c0_i32 = arith.constant 0 : i32
    %c0_i32_0 = arith.constant 0 : i32
    %c0_i32_1 = arith.constant 0 : i32
    %c0_i32_2 = arith.constant 0 : i32
    return %arg0, %c0_i32, %c0_i32_0, %c0_i32_1 : i32, i32, i32, i32
  }
  func.func @transform_1(%arg0: i32) -> (i32, i32, i32) {
    %c0_i32 = arith.constant 0 : i32
    %c0_i32_0 = arith.constant 0 : i32
    %c0_i32_1 = arith.constant 0 : i32
    %c0_i32_2 = arith.constant 0 : i32
    return %c0_i32, %c0_i32_0, %c0_i32_1 : i32, i32, i32
  }
  func.func @transform_2(%arg0: i32) -> (i32, i32) {
    %c0_i32 = arith.constant 0 : i32
    %c0_i32_0 = arith.constant 0 : i32
    %c0_i32_1 = arith.constant 0 : i32
    return %c0_i32, %c0_i32_0 : i32, i32
  }
  func.func @transform_3(%arg0: i32) -> (i32, i32) {
    %c0_i32 = arith.constant 0 : i32
    %c0_i32_0 = arith.constant 0 : i32
    %c0_i32_1 = arith.constant 0 : i32
    return %c0_i32, %c0_i32_0 : i32, i32
  }
  func.func @transform_4(%arg0: i32) -> (i32, i32, i32) {
    %c0_i32 = arith.constant 0 : i32
    %c0_i32_0 = arith.constant 0 : i32
    %c0_i32_1 = arith.constant 0 : i32
    return %arg0, %c0_i32, %c0_i32_0 : i32, i32, i32
  }
  func.func @transform_5(%arg0: i32) -> (i32, i32) {
    %c0_i32 = arith.constant 0 : i32
    %c0_i32_0 = arith.constant 0 : i32
    %c0_i32_1 = arith.constant 0 : i32
    return %c0_i32, %c0_i32_0 : i32, i32
  }
  func.func @transform_6(%arg0: i32) -> (i32, i32) {
    %c0_i32 = arith.constant 0 : i32
    %c0_i32_0 = arith.constant 0 : i32
    %c0_i32_1 = arith.constant 0 : i32
    return %c0_i32, %c0_i32_0 : i32, i32
  }
}

</mosaic_0001>

<bundles_post_ra>
// kernel: tpu_custom_call.1
= control target key start
LH: loop header
LB: loop body
LE: loop exit
PB: predicated region body
PF: predicated region fallthrough
CT: control target
= control target key end

     0   :  { %12 = vsyncpa [#allocation5], 0  ;;  %s2893_s0 = inlined_call_operand.hbm [shape: f32[8,4,8,32], index: 0, kind: input, shape index: {}]   ;;  %s2894_s1 = inlined_call_operand.hbm [shape: bf16[4,32,32], index: 1, kind: input, shape index: {}]   ;;  %s2895_s2 = inlined_call_operand.hbm [shape: f32[8,32], index: 2, kind: input, shape index: {}]   ;;  %s2896_s3 = inlined_call_operand.hbm [shape: f32[8,32], index: 3, kind: input, shape index: {}]   ;;  %s2897_s4 = inlined_call_operand.hbm [shape: bf16[8,8,32], index: 4, kind: output, shape index: {0}]   ;;  %s2898_s5 = inlined_call_operand.hbm [shape: f32[8,32], index: 5, kind: output, shape index: {1}]   ;;  %s2899_s6 = inlined_call_operand.hbm [shape: f32[8,32], index: 6, kind: output, shape index: {2}]  }
   0x1   :  { %13 = vsyncpa [#allocation8], 0 }
   0x2   :  { %14 = vsyncpa [#allocation11], 0 }
   0x3   :  { %15 = vsyncpa [#allocation6], 0 }
   0x4   :  { %16 = vsyncpa [#allocation14], 0  ;;  %s2558_s21 = smov [#allocation7]  }
   0x5   :  { %s34_s22 = sshll.u32 %s2558_s21, 4  ;;  %s35_s22 = int_to_ptr.vmem [resolvable:$true] %s34_s22 }
   0x6   :  { %s2416_s23 = scalar_lea.vmem %s35_s22, 1024  ;;  %p2421_p1 = scmp.lt.s32.totalorder %s35_s22, %s35_s22 }
   0x7   :  { %p2417_p0 = scmp.ne.s32.totalorder %s35_s22, %s2416_s23  ;;  %p2422_p2 = scmp.lt.s32.totalorder %s2416_s23, %s2416_s23 }
   0x9   :  { %p2423_p3 = por %p2422_p2, %p2421_p1 }
   0xb   :  { %p2424_p4 = pnand %p2423_p3, %p2417_p0 }
   0xd   :  { %2427 = shalt.err (!%p2424_p4)
}
   0xe   :  { %s2559_s24 = smov 64   ;;  %s2560_s25 = smov 4  }
   0xf   :  { %40 = dma.hbm_to_vmem [thread:$0]  %s2894_s1, 1024, %s35_s22, [#allocation8], %s2559_s24, %s2559_s24, %s2560_s25  }
  0x10   :  { %s2561_s28 = smov [#allocation4]  }
  0x11   :  { %s22_s29 = sshll.u32 %s2561_s28, 4  ;;  %s23_s29 = int_to_ptr.vmem [resolvable:$true] %s22_s29 }
  0x12   :  { %s2436_s30 = scalar_lea.vmem %s23_s29, 4096  ;;  %p2441_p6 = scmp.lt.s32.totalorder %s23_s29, %s23_s29 }
  0x13   :  { %p2437_p5 = scmp.ne.s32.totalorder %s23_s29, %s2436_s30  ;;  %p2442_p7 = scmp.lt.s32.totalorder %s2436_s30, %s2436_s30 }
  0x15   :  { %p2443_p8 = por %p2442_p7, %p2441_p6 }
  0x17   :  { %p2444_p9 = pnand %p2443_p8, %p2437_p5 }
  0x19   :  { %2447 = shalt.err (!%p2444_p9)
}
  0x1a   :  { %s2562_s7 = smov 128   ;;  %s2563_s8 = smov 8  }
  0x1b   :  { %28 = dma.hbm_to_vmem [thread:$0]  %s2893_s0, 4096, %s23_s29, [#allocation5], %s2562_s7, %s2562_s7, %s2563_s8  }
  0x1c   :  { %s2564_s11 = smov [#allocation9]   ;;  %s2565_s13 = smov [#allocation10]  }
  0x1d   :  { %s47_s12 = sshll.u32 %s2564_s11, 4  ;;  %s57_s1 = sshll.u32 %s2565_s13, 4  ;;  %s48_s12 = int_to_ptr.vmem [resolvable:$true] %s47_s12  ;;  %s58_s1 = int_to_ptr.vmem [resolvable:$true] %s57_s1 }
  0x1e   :  { %s2456_s14 = scalar_lea.vmem %s48_s12, 128  ;;  %p2461_p11 = scmp.lt.s32.totalorder %s48_s12, %s48_s12 }
  0x1f   :  { %p2457_p10 = scmp.ne.s32.totalorder %s48_s12, %s2456_s14  ;;  %p2462_p12 = scmp.lt.s32.totalorder %s2456_s14, %s2456_s14 }
  0x21   :  { %p2463_p13 = por %p2462_p12, %p2461_p11 }
  0x23   :  { %p2464_p0 = pnand %p2463_p13, %p2457_p10 }
  0x25   :  { %2467 = shalt.err (!%p2464_p0)
}
  0x26   :  { %50 = dma.hbm_to_vmem [thread:$0]  %s2895_s2, 128, %s48_s12, [#allocation8]  }
  0x27   :  { %s2476_s17 = scalar_lea.vmem %s58_s1, 128  ;;  %p2481_p2 = scmp.lt.s32.totalorder %s58_s1, %s58_s1 }
  0x28   :  { %p2477_p1 = scmp.ne.s32.totalorder %s58_s1, %s2476_s17  ;;  %p2482_p3 = scmp.lt.s32.totalorder %s2476_s17, %s2476_s17 }
  0x2a   :  { %p2483_p4 = por %p2482_p3, %p2481_p2 }
  0x2c   :  { %p2484_p5 = pnand %p2483_p4, %p2477_p1 }
  0x2e   :  { %2487 = shalt.err (!%p2484_p5)
}
  0x2f   :  { %60 = dma.hbm_to_vmem [thread:$0]  %s2896_s3, 128, %s58_s1, [#allocation11]  }
  0x30   :  { %2548 = dma.done.wait [#allocation5], 4096  }
  0x31   :  { %2549 = vsyncadd [#allocation5], 4294963200 }
  0x32   :  { %2550 = dma.done.wait [#allocation8], 1152  }
  0x33   :  { %2551 = vsyncadd [#allocation8], 4294966144 }
  0x34   :  { %2552 = dma.done.wait [#allocation11], 128  }
  0x35   :  { %2553 = vsyncadd [#allocation11], 4294967168  ;;  %v2566_v0 = vmov 0.0   ;;  %vm2567_vm0 = vmmov 0   ;;  %v2627_v1 = vld [vmem:[#allocation7 + $0x8] sm:$0xff]   ;;  %v2629_v2 = vld [vmem:[#allocation7 + $0x18] sm:$0xff]  }
  0x36   :  { %1995 = vmatprep.subr.bf16.mxu0 %v2566_v0  ;;  %2003 = vmatprep.subr.bf16.mxu1 %v2566_v0  ;;  %v2632_v3 = vld [vmem:[#allocation7] sm:$0xff]   ;;  %vm79_vm1 = vcmask 261120   ;;  %v2636_v4 = vld [vmem:[#allocation7 + $0x10] sm:$0xff]   ;;  %v2644_v7 = vld [vmem:[#allocation7 + $0x28] sm:$0xff]   ;;  %vm352_vm2 = vcmask 257024   ;;  %s2568_s2 = smov [#allocation12]  }
  0x37   :  { %1999 = vmatprep.mubr.msk.bf16.mxu0 %vm2567_vm0, %v2566_v0  ;;  %2007 = vmatprep.mubr.msk.bf16.mxu1 %vm2567_vm0, %v2566_v0  ;;  %v78_v5 = vld [vmem:[#allocation9] sm:$0xff]  ;;  %v2646_v8 = vld [vmem:[#allocation7 + $0x38] sm:$0xff]   ;;  %v2654_v11 = vld [vmem:[#allocation7 + $0x30] sm:$0xff]   ;;  %s1794_s3 = sshll.u32 %s2568_s2, 4  ;;  %s2569_s19 = smov [#allocation13]   ;;  %s1795_s3 = int_to_ptr.vmem [resolvable:$true] %s1794_s3 }
  0x38   :  { %1996 = vmatpush3.bf16.msra.mxu0 %v2627_v1  ;;  %2004 = vmatpush3.bf16.msra.mxu1 %v2629_v2  ;;  %80 = vst.msk [vmem:[#allocation2] sm:$0xff] %vm79_vm1, %v78_v5  ;;  %v2652_v10 = vld [vmem:[#allocation7 + $0x20] sm:$0xff]   ;;  %v81_v12 = vld [vmem:[#allocation10] sm:$0xff]  ;;  %v105_v27 = vld [vmem:[#allocation4 + $0x18] sm:$0xff]  ;;  %s1807_s20 = sshll.u32 %s2569_s19, 4  ;;  %s2488_s21 = scalar_lea.vmem %s1795_s3, 512  ;;  %s1808_s20 = int_to_ptr.vmem [resolvable:$true] %s1807_s20 }
  0x39   :  { %1997 = vmatprep.subr.bf16.mxu0 %v2566_v0  ;;  %2005 = vmatprep.subr.bf16.mxu1 %v2566_v0  ;;  %82 = vst.msk [vmem:[#allocation3] sm:$0xff] %vm79_vm1, %v81_v12  ;;  %v102_v13 = vld [vmem:[#allocation4] sm:$0xff]  ;;  %v103_v14 = vld [vmem:[#allocation4 + $0x8] sm:$0xff]  ;;  %v104_v33 = vld [vmem:[#allocation4 + $0x10] sm:$0xff]  ;;  %p2489_p6 = scmp.ne.s32.totalorder %s1795_s3, %s2488_s21  ;;  %p2493_p7 = scmp.lt.s32.totalorder %s1795_s3, %s1795_s3 }
  0x3a   :  { %v355_v59 = vld [vmem:[#allocation4 + $0x20] sm:$0xff]  ;;  %v356_v60 = vld [vmem:[#allocation4 + $0x28] sm:$0xff]  ;;  %p2494_p8 = scmp.lt.s32.totalorder %s2488_s21, %s2488_s21 }
  0x3c   :  { %1998 = vmatpush3.bf16.msra.mxu0 %v2632_v3  ;;  %2006 = vmatpush3.bf16.msra.mxu1 %v2636_v4  ;;  %p2495_p9 = por %p2494_p8, %p2493_p7 }
  0x3d   :  { %2011 = vmatprep.subr.bf16.mxu0 %v2566_v0  ;;  %2019 = vmatprep.subr.bf16.mxu1 %v2566_v0 }
  0x3e   :  { %p2496_p10 = pnand %p2495_p9, %p2489_p6 }
  0x3f   :  { %v106_v6 = vld [vmem:[#allocation2] sm:$0xff] }
  0x40   :  { %v108_v9 = vpack.c.bf16 %v106_v6, %v106_v6  ;;  %v107_v46 = vld [vmem:[#allocation3] sm:$0xff] }
  0x42   :  { %2000 = vmatmul.mubr.msk.bf16.vlgmr.msra.gmra.mxu0 %vm79_vm1, %v108_v9  ;;  %2008 = vmatmul.mubr.msk.bf16.vlgmr.msra.gmra.mxu1 %vm79_vm1, %v108_v9 }
  0x43   :  { %2012 = vmatpush3.bf16.msra.mxu0 %v2644_v7  ;;  %2020 = vmatpush3.bf16.msra.mxu1 %v2646_v8 }
  0x44   :  { %2013 = vmatprep.subr.bf16.mxu0 %v2566_v0  ;;  %2021 = vmatprep.subr.bf16.mxu1 %v2566_v0 }
  0x45   :  { %2015 = vmatprep.mubr.msk.bf16.mxu0 %vm2567_vm0, %v2566_v0  ;;  %2023 = vmatprep.mubr.msk.bf16.mxu1 %vm2567_vm0, %v2566_v0 }
  0x47   :  { %2014 = vmatpush3.bf16.msra.mxu0 %v2652_v10  ;;  %2022 = vmatpush3.bf16.msra.mxu1 %v2654_v11 }
  0x48   :  { %2027 = vmatprep.subr.bf16.mxu0 %v2566_v0  ;;  %2035 = vmatprep.subr.bf16.mxu1 %v2566_v0 }
  0x4a   :  { %2016 = vmatmul.mubr.msk.bf16.vlgmr.msra.gmra.mxu0 %vm79_vm1, %v108_v9  ;;  %2024 = vmatmul.mubr.msk.bf16.vlgmr.msra.gmra.mxu1 %vm79_vm1, %v108_v9 }
  0x4b   :  { %2028 = vmatpush3.bf16.msra.mxu0 %v2627_v1  ;;  %2036 = vmatpush3.bf16.msra.mxu1 %v2629_v2 }
  0x4c   :  { %2029 = vmatprep.subr.bf16.mxu0 %v2566_v0  ;;  %2037 = vmatprep.subr.bf16.mxu1 %v2566_v0 }
  0x4d   :  { %2031 = vmatprep.mubr.msk.bf16.mxu0 %vm2567_vm0, %v2566_v0  ;;  %2039 = vmatprep.mubr.msk.bf16.mxu1 %vm2567_vm0, %v2566_v0 }
  0x4f   :  { %2030 = vmatpush3.bf16.msra.mxu0 %v2632_v3  ;;  %2038 = vmatpush3.bf16.msra.mxu1 %v2636_v4 }
  0x50   :  { %2043 = vmatprep.subr.bf16.mxu0 %v2566_v0  ;;  %2051 = vmatprep.subr.bf16.mxu1 %v2566_v0 }
 0x102   :  { %v159_v15 = vpop.f32.mrf.mxu0  ;;  %v212_v16 = vpop.f32.mrf.mxu1 }
 0x103   :  { %v165_v17 = vadd.f32 %v159_v15, %v102_v13  ;;  %v218_v18 = vadd.f32 %v212_v16, %v103_v14 }
 0x104   :  { %v2001_v19 = vpop.f32.mrf.mxu0  ;;  %v2009_v20 = vpop.f32.mrf.mxu1 }
 0x105   :  { %v1847_v21 = vmul.f32 -1.442695, %v165_v17  ;;  %v1848_v22 = vmul.f32 -1.442695, %v218_v18  ;;  %v358_v19 = vld [vmem:[#allocation4 + $0x38] sm:$0xff] }
 0x106   :  { %v162_v23 = vpop.f32.mrf.mxu0  ;;  %v215_v24 = vpop.f32.mrf.mxu1 }
 0x107   :  { %2272 = vpow2.f32 %v1847_v21 }
 0x108   :  { %2274 = vpow2.f32 %v1848_v22  ;;  %v2002_v25 = vpop.f32.mrf.mxu0  ;;  %v2010_v26 = vpop.f32.mrf.mxu1 }
 0x109   :  { %v357_v26 = vld [vmem:[#allocation4 + $0x30] sm:$0xff] }
 0x10a   :  { %v265_v28 = vpop.f32.mrf.mxu0  ;;  %v318_v29 = vpop.f32.mrf.mxu1 }
 0x10b   :  { %v324_v30 = vadd.f32 %v318_v29, %v105_v27  ;;  %v271_v39 = vadd.f32 %v265_v28, %v104_v33 }
 0x10c   :  { %v2017_v31 = vpop.f32.mrf.mxu0  ;;  %v2025_v32 = vpop.f32.mrf.mxu1 }
 0x10d   :  { %v1849_v36 = vmul.f32 -1.442695, %v324_v30 }
 0x10e   :  { %v268_v34 = vpop.f32.mrf.mxu0  ;;  %v321_v35 = vpop.f32.mrf.mxu1 }
 0x10f   :  { %2276 = vpow2.f32 %v1849_v36 }
 0x110   :  { %v2018_v37 = vpop.f32.mrf.mxu0  ;;  %v2026_v38 = vpop.f32.mrf.mxu1  ;;  %2278 = vtanh.f32 %v271_v39 }
 0x114   :  { %v2273_v40 = vpop.eup %2272 }
 0x115   :  { %v2275_v41 = vpop.eup %2274  ;;  %v328_v42 = vadd.f32 1.0, %v2273_v40 }
 0x116   :  { %v334_v43 = vadd.f32 1.0, %v2275_v41 }
 0x117   :  { %2280 = vrcp.f32 %v328_v42 }
 0x118   :  { %2282 = vrcp.f32 %v334_v43 }
 0x11c   :  { %v2277_v44 = vpop.eup %2276 }
 0x11d   :  { %v2279_v45 = vpop.eup %2278  ;;  %v341_v48 = vadd.f32 1.0, %v2277_v44 }
 0x11f   :  { %2284 = vrcp.f32 %v341_v48 }
 0x124   :  { %v2281_v47 = vpop.eup %2280 }
 0x125   :  { %v2283_v49 = vpop.eup %2282  ;;  %v345_v50 = vmul.f32 %v2281_v47, %v2279_v45 }
 0x126   :  { %v344_v51 = vmul.f32 %v2283_v49, %v107_v46 }
 0x128   :  { %v346_v52 = vadd.f32 %v345_v50, %v344_v51  ;;  %v559_v50 = vld [vmem:[#allocation4 + $0x40] sm:$0xff]  ;;  %v560_v51 = vld [vmem:[#allocation4 + $0x48] sm:$0xff] }
 0x12a   :  { %2286 = vtanh.f32 %v346_v52  ;;  %350 = vst.msk [vmem:[#allocation3] sm:$0xff] %vm79_vm1, %v346_v52 }
 0x12c   :  { %v2285_v53 = vpop.eup %2284 }
 0x131   :  { %v360_v39 = vld [vmem:[#allocation3] sm:$0xff] }
 0x137   :  { %v2287_v54 = vpop.eup %2286 }
 0x138   :  { %v348_v55 = vmul.f32 %v2287_v54, %v2285_v53 }
 0x13a   :  { %349 = vst.msk [vmem:[#allocation2] sm:$0xff] %vm79_vm1, %v348_v55  ;;  %v351_v56 = vpack.c.bf16 %v348_v55, %v348_v55 }
 0x13c   :  { %353 = vst.msk [vmem:[#allocation12] sm:$0xf] %vm352_vm2, %v351_v56 }
 0x141   :  { %v359_v57 = vld [vmem:[#allocation2] sm:$0xff] }
 0x142   :  { %v361_v58 = vpack.c.bf16 %v359_v57, %v359_v57 }
 0x144   :  { %2032 = vmatmul.mubr.msk.bf16.vlgmr.msra.gmra.mxu0 %vm79_vm1, %v361_v58  ;;  %2040 = vmatmul.mubr.msk.bf16.vlgmr.msra.gmra.mxu1 %vm79_vm1, %v361_v58 }
 0x145   :  { %2044 = vmatpush3.bf16.msra.mxu0 %v2644_v7  ;;  %2052 = vmatpush3.bf16.msra.mxu1 %v2646_v8 }
 0x146   :  { %2045 = vmatprep.subr.bf16.mxu0 %v2566_v0  ;;  %2053 = vmatprep.subr.bf16.mxu1 %v2566_v0 }
 0x147   :  { %2047 = vmatprep.mubr.msk.bf16.mxu0 %vm2567_vm0, %v2566_v0  ;;  %2055 = vmatprep.mubr.msk.bf16.mxu1 %vm2567_vm0, %v2566_v0 }
 0x149   :  { %2046 = vmatpush3.bf16.msra.mxu0 %v2652_v10  ;;  %2054 = vmatpush3.bf16.msra.mxu1 %v2654_v11 }
 0x14a   :  { %2059 = vmatprep.subr.bf16.mxu0 %v2566_v0  ;;  %2067 = vmatprep.subr.bf16.mxu1 %v2566_v0 }
 0x14c   :  { %2048 = vmatmul.mubr.msk.bf16.vlgmr.msra.gmra.mxu0 %vm79_vm1, %v361_v58  ;;  %2056 = vmatmul.mubr.msk.bf16.vlgmr.msra.gmra.mxu1 %vm79_vm1, %v361_v58 }
 0x14d   :  { %2060 = vmatpush3.bf16.msra.mxu0 %v2627_v1  ;;  %2068 = vmatpush3.bf16.msra.mxu1 %v2629_v2 }
 0x14e   :  { %2061 = vmatprep.subr.bf16.mxu0 %v2566_v0  ;;  %2069 = vmatprep.subr.bf16.mxu1 %v2566_v0 }
 0x14f   :  { %2063 = vmatprep.mubr.msk.bf16.mxu0 %vm2567_vm0, %v2566_v0  ;;  %2071 = vmatprep.mubr.msk.bf16.mxu1 %vm2567_vm0, %v2566_v0 }
 0x151   :  { %2062 = vmatpush3.bf16.msra.mxu0 %v2632_v3  ;;  %2070 = vmatpush3.bf16.msra.mxu1 %v2636_v4 }
 0x152   :  { %2075 = vmatprep.subr.bf16.mxu0 %v2566_v0  ;;  %2083 = vmatprep.subr.bf16.mxu1 %v2566_v0 }
 0x204   :  { %v399_v61 = vpop.f32.mrf.mxu0  ;;  %v440_v62 = vpop.f32.mrf.mxu1 }
 0x205   :  { %v405_v63 = vadd.f32 %v399_v61, %v355_v59  ;;  %v446_v5 = vadd.f32 %v440_v62, %v356_v60 }
 0x206   :  { %v2033_v6 = vpop.f32.mrf.mxu0  ;;  %v2041_v9 = vpop.f32.mrf.mxu1 }
 0x207   :  { %v1854_v12 = vmul.f32 -1.442695, %v405_v63  ;;  %v1855_v13 = vmul.f32 -1.442695, %v446_v5  ;;  %v562_v6 = vld [vmem:[#allocation4 + $0x58] sm:$0xff] }
 0x208   :  { %v402_v14 = vpop.f32.mrf.mxu0  ;;  %v443_v15 = vpop.f32.mrf.mxu1 }
 0x209   :  { %2288 = vpow2.f32 %v1854_v12 }
 0x20a   :  { %2290 = vpow2.f32 %v1855_v13  ;;  %v2034_v16 = vpop.f32.mrf.mxu0  ;;  %v2042_v17 = vpop.f32.mrf.mxu1 }
 0x20b   :  { %v561_v17 = vld [vmem:[#allocation4 + $0x50] sm:$0xff] }
 0x20c   :  { %v481_v18 = vpop.f32.mrf.mxu0  ;;  %v522_v20 = vpop.f32.mrf.mxu1 }
 0x20d   :  { %v528_v23 = vadd.f32 %v522_v20, %v358_v19  ;;  %v487_v30 = vadd.f32 %v481_v18, %v357_v26 }
 0x20e   :  { %v2049_v21 = vpop.f32.mrf.mxu0  ;;  %v2057_v22 = vpop.f32.mrf.mxu1 }
 0x20f   :  { %v1856_v29 = vmul.f32 -1.442695, %v528_v23 }
 0x210   :  { %v484_v24 = vpop.f32.mrf.mxu0  ;;  %v525_v25 = vpop.f32.mrf.mxu1 }
 0x211   :  { %2292 = vpow2.f32 %v1856_v29 }
 0x212   :  { %v2050_v27 = vpop.f32.mrf.mxu0  ;;  %v2058_v28 = vpop.f32.mrf.mxu1  ;;  %2294 = vtanh.f32 %v487_v30 }
 0x216   :  { %v2289_v31 = vpop.eup %2288 }
 0x217   :  { %v2291_v32 = vpop.eup %2290  ;;  %v532_v33 = vadd.f32 1.0, %v2289_v31 }
 0x218   :  { %v538_v34 = vadd.f32 1.0, %v2291_v32 }
 0x219   :  { %2296 = vrcp.f32 %v532_v33 }
 0x21a   :  { %2298 = vrcp.f32 %v538_v34 }
 0x21e   :  { %v2293_v35 = vpop.eup %2292 }
 0x21f   :  { %v2295_v36 = vpop.eup %2294  ;;  %v545_v41 = vadd.f32 1.0, %v2293_v35 }
 0x221   :  { %2300 = vrcp.f32 %v545_v41  ;;  %v763_v41 = vld [vmem:[#allocation4 + $0x60] sm:$0xff] }
 0x226   :  { %v2297_v37 = vpop.eup %2296 }
 0x227   :  { %v2299_v38 = vpop.eup %2298  ;;  %v549_v40 = vmul.f32 %v2297_v37, %v2295_v36 }
 0x228   :  { %v548_v42 = vmul.f32 %v2299_v38, %v360_v39 }
 0x22a   :  { %v550_v43 = vadd.f32 %v549_v40, %v548_v42  ;;  %v764_v42 = vld [vmem:[#allocation4 + $0x68] sm:$0xff] }
 0x22c   :  { %2302 = vtanh.f32 %v550_v43  ;;  %554 = vst.msk [vmem:[#allocation3] sm:$0xff] %vm79_vm1, %v550_v43 }
 0x22e   :  { %v2301_v44 = vpop.eup %2300 }
 0x233   :  { %v564_v30 = vld [vmem:[#allocation3] sm:$0xff] }
 0x239   :  { %v2303_v45 = vpop.eup %2302 }
 0x23a   :  { %v552_v46 = vmul.f32 %v2303_v45, %v2301_v44 }
 0x23c   :  { %553 = vst.msk [vmem:[#allocation2] sm:$0xff] %vm79_vm1, %v552_v46  ;;  %v555_v47 = vpack.c.bf16 %v552_v46, %v552_v46 }
 0x23e   :  { %557 = vst.msk [vmem:[#allocation12 + $0x4] sm:$0xf] %vm352_vm2, %v555_v47 }
 0x243   :  { %v563_v48 = vld [vmem:[#allocation2] sm:$0xff] }
 0x244   :  { %v565_v49 = vpack.c.bf16 %v563_v48, %v563_v48 }
 0x246   :  { %2064 = vmatmul.mubr.msk.bf16.vlgmr.msra.gmra.mxu0 %vm79_vm1, %v565_v49  ;;  %2072 = vmatmul.mubr.msk.bf16.vlgmr.msra.gmra.mxu1 %vm79_vm1, %v565_v49 }
 0x247   :  { %2076 = vmatpush3.bf16.msra.mxu0 %v2644_v7  ;;  %2084 = vmatpush3.bf16.msra.mxu1 %v2646_v8 }
 0x248   :  { %2077 = vmatprep.subr.bf16.mxu0 %v2566_v0  ;;  %2085 = vmatprep.subr.bf16.mxu1 %v2566_v0 }
 0x249   :  { %2079 = vmatprep.mubr.msk.bf16.mxu0 %vm2567_vm0, %v2566_v0  ;;  %2087 = vmatprep.mubr.msk.bf16.mxu1 %vm2567_vm0, %v2566_v0 }
 0x24b   :  { %2078 = vmatpush3.bf16.msra.mxu0 %v2652_v10  ;;  %2086 = vmatpush3.bf16.msra.mxu1 %v2654_v11 }
 0x24c   :  { %2091 = vmatprep.subr.bf16.mxu0 %v2566_v0  ;;  %2099 = vmatprep.subr.bf16.mxu1 %v2566_v0 }
 0x24e   :  { %2080 = vmatmul.mubr.msk.bf16.vlgmr.msra.gmra.mxu0 %vm79_vm1, %v565_v49  ;;  %2088 = vmatmul.mubr.msk.bf16.vlgmr.msra.gmra.mxu1 %vm79_vm1, %v565_v49 }
 0x24f   :  { %2092 = vmatpush3.bf16.msra.mxu0 %v2627_v1  ;;  %2100 = vmatpush3.bf16.msra.mxu1 %v2629_v2 }
 0x250   :  { %2093 = vmatprep.subr.bf16.mxu0 %v2566_v0  ;;  %2101 = vmatprep.subr.bf16.mxu1 %v2566_v0 }
 0x251   :  { %2095 = vmatprep.mubr.msk.bf16.mxu0 %vm2567_vm0, %v2566_v0  ;;  %2103 = vmatprep.mubr.msk.bf16.mxu1 %vm2567_vm0, %v2566_v0 }
 0x253   :  { %2094 = vmatpush3.bf16.msra.mxu0 %v2632_v3  ;;  %2102 = vmatpush3.bf16.msra.mxu1 %v2636_v4 }
 0x254   :  { %2107 = vmatprep.subr.bf16.mxu0 %v2566_v0  ;;  %2115 = vmatprep.subr.bf16.mxu1 %v2566_v0 }
 0x306   :  { %v603_v52 = vpop.f32.mrf.mxu0  ;;  %v644_v53 = vpop.f32.mrf.mxu1 }
 0x307   :  { %v609_v54 = vadd.f32 %v603_v52, %v559_v50  ;;  %v650_v55 = vadd.f32 %v644_v53, %v560_v51 }
 0x308   :  { %v2065_v56 = vpop.f32.mrf.mxu0  ;;  %v2073_v57 = vpop.f32.mrf.mxu1 }
 0x309   :  { %v1861_v58 = vmul.f32 -1.442695, %v609_v54  ;;  %v1862_v59 = vmul.f32 -1.442695, %v650_v55  ;;  %v766_v56 = vld [vmem:[#allocation4 + $0x78] sm:$0xff] }
 0x30a   :  { %v606_v60 = vpop.f32.mrf.mxu0  ;;  %v647_v61 = vpop.f32.mrf.mxu1 }
 0x30b   :  { %2304 = vpow2.f32 %v1861_v58 }
 0x30c   :  { %2306 = vpow2.f32 %v1862_v59  ;;  %v2066_v62 = vpop.f32.mrf.mxu0  ;;  %v2074_v63 = vpop.f32.mrf.mxu1 }
 0x30d   :  { %v765_v63 = vld [vmem:[#allocation4 + $0x70] sm:$0xff] }
 0x30e   :  { %v685_v5 = vpop.f32.mrf.mxu0  ;;  %v726_v9 = vpop.f32.mrf.mxu1 }
 0x30f   :  { %v732_v14 = vadd.f32 %v726_v9, %v562_v6  ;;  %v691_v21 = vadd.f32 %v685_v5, %v561_v17 }
 0x310   :  { %v2081_v12 = vpop.f32.mrf.mxu0  ;;  %v2089_v13 = vpop.f32.mrf.mxu1 }
 0x311   :  { %v1863_v20 = vmul.f32 -1.442695, %v732_v14 }
 0x312   :  { %v688_v15 = vpop.f32.mrf.mxu0  ;;  %v729_v16 = vpop.f32.mrf.mxu1 }
 0x313   :  { %2308 = vpow2.f32 %v1863_v20 }
 0x314   :  { %v2082_v18 = vpop.f32.mrf.mxu0  ;;  %v2090_v19 = vpop.f32.mrf.mxu1  ;;  %2310 = vtanh.f32 %v691_v21 }
 0x318   :  { %v2305_v22 = vpop.eup %2304 }
 0x319   :  { %v2307_v23 = vpop.eup %2306  ;;  %v736_v24 = vadd.f32 1.0, %v2305_v22 }
 0x31a   :  { %v742_v25 = vadd.f32 1.0, %v2307_v23 }
 0x31b   :  { %2312 = vrcp.f32 %v736_v24 }
 0x31c   :  { %2314 = vrcp.f32 %v742_v25 }
 0x320   :  { %v2309_v26 = vpop.eup %2308 }
 0x321   :  { %v2311_v27 = vpop.eup %2310  ;;  %v749_v32 = vadd.f32 1.0, %v2309_v26 }
 0x323   :  { %2316 = vrcp.f32 %v749_v32  ;;  %v967_v32 = vld [vmem:[#allocation4 + $0x80] sm:$0xff] }
 0x328   :  { %v2313_v28 = vpop.eup %2312 }
 0x329   :  { %v2315_v29 = vpop.eup %2314  ;;  %v753_v31 = vmul.f32 %v2313_v28, %v2311_v27 }
 0x32a   :  { %v752_v33 = vmul.f32 %v2315_v29, %v564_v30 }
 0x32c   :  { %v754_v34 = vadd.f32 %v753_v31, %v752_v33  ;;  %v968_v33 = vld [vmem:[#allocation4 + $0x88] sm:$0xff] }
 0x32e   :  { %2318 = vtanh.f32 %v754_v34  ;;  %758 = vst.msk [vmem:[#allocation3] sm:$0xff] %vm79_vm1, %v754_v34 }
 0x330   :  { %v2317_v35 = vpop.eup %2316 }
 0x335   :  { %v768_v21 = vld [vmem:[#allocation3] sm:$0xff] }
 0x33b   :  { %v2319_v36 = vpop.eup %2318 }
 0x33c   :  { %v756_v37 = vmul.f32 %v2319_v36, %v2317_v35 }
 0x33e   :  { %757 = vst.msk [vmem:[#allocation2] sm:$0xff] %vm79_vm1, %v756_v37  ;;  %v759_v38 = vpack.c.bf16 %v756_v37, %v756_v37 }
 0x340   :  { %761 = vst.msk [vmem:[#allocation12 + $0x8] sm:$0xf] %vm352_vm2, %v759_v38 }
 0x345   :  { %v767_v39 = vld [vmem:[#allocation2] sm:$0xff] }
 0x346   :  { %v769_v40 = vpack.c.bf16 %v767_v39, %v767_v39 }
 0x348   :  { %2096 = vmatmul.mubr.msk.bf16.vlgmr.msra.gmra.mxu0 %vm79_vm1, %v769_v40  ;;  %2104 = vmatmul.mubr.msk.bf16.vlgmr.msra.gmra.mxu1 %vm79_vm1, %v769_v40 }
 0x349   :  { %2108 = vmatpush3.bf16.msra.mxu0 %v2644_v7  ;;  %2116 = vmatpush3.bf16.msra.mxu1 %v2646_v8 }
 0x34a   :  { %2109 = vmatprep.subr.bf16.mxu0 %v2566_v0  ;;  %2117 = vmatprep.subr.bf16.mxu1 %v2566_v0 }
 0x34b   :  { %2111 = vmatprep.mubr.msk.bf16.mxu0 %vm2567_vm0, %v2566_v0  ;;  %2119 = vmatprep.mubr.msk.bf16.mxu1 %vm2567_vm0, %v2566_v0 }
 0x34d   :  { %2110 = vmatpush3.bf16.msra.mxu0 %v2652_v10  ;;  %2118 = vmatpush3.bf16.msra.mxu1 %v2654_v11 }
 0x34e   :  { %2123 = vmatprep.subr.bf16.mxu0 %v2566_v0  ;;  %2131 = vmatprep.subr.bf16.mxu1 %v2566_v0 }
 0x350   :  { %2112 = vmatmul.mubr.msk.bf16.vlgmr.msra.gmra.mxu0 %vm79_vm1, %v769_v40  ;;  %2120 = vmatmul.mubr.msk.bf16.vlgmr.msra.gmra.mxu1 %vm79_vm1, %v769_v40 }
 0x351   :  { %2124 = vmatpush3.bf16.msra.mxu0 %v2627_v1  ;;  %2132 = vmatpush3.bf16.msra.mxu1 %v2629_v2 }
 0x352   :  { %2125 = vmatprep.subr.bf16.mxu0 %v2566_v0  ;;  %2133 = vmatprep.subr.bf16.mxu1 %v2566_v0 }
 0x353   :  { %2127 = vmatprep.mubr.msk.bf16.mxu0 %vm2567_vm0, %v2566_v0  ;;  %2135 = vmatprep.mubr.msk.bf16.mxu1 %vm2567_vm0, %v2566_v0 }
 0x355   :  { %2126 = vmatpush3.bf16.msra.mxu0 %v2632_v3  ;;  %2134 = vmatpush3.bf16.msra.mxu1 %v2636_v4 }
 0x356   :  { %2139 = vmatprep.subr.bf16.mxu0 %v2566_v0  ;;  %2147 = vmatprep.subr.bf16.mxu1 %v2566_v0 }
 0x408   :  { %v807_v43 = vpop.f32.mrf.mxu0  ;;  %v848_v44 = vpop.f32.mrf.mxu1 }
 0x409   :  { %v813_v45 = vadd.f32 %v807_v43, %v763_v41  ;;  %v854_v46 = vadd.f32 %v848_v44, %v764_v42 }
 0x40a   :  { %v2097_v47 = vpop.f32.mrf.mxu0  ;;  %v2105_v48 = vpop.f32.mrf.mxu1 }
 0x40b   :  { %v1868_v49 = vmul.f32 -1.442695, %v813_v45  ;;  %v1869_v50 = vmul.f32 -1.442695, %v854_v46  ;;  %v970_v47 = vld [vmem:[#allocation4 + $0x98] sm:$0xff] }
 0x40c   :  { %v810_v51 = vpop.f32.mrf.mxu0  ;;  %v851_v52 = vpop.f32.mrf.mxu1 }
 0x40d   :  { %2320 = vpow2.f32 %v1868_v49 }
 0x40e   :  { %2322 = vpow2.f32 %v1869_v50  ;;  %v2098_v53 = vpop.f32.mrf.mxu0  ;;  %v2106_v54 = vpop.f32.mrf.mxu1 }
 0x40f   :  { %v969_v54 = vld [vmem:[#allocation4 + $0x90] sm:$0xff] }
 0x410   :  { %v889_v55 = vpop.f32.mrf.mxu0  ;;  %v930_v57 = vpop.f32.mrf.mxu1 }
 0x411   :  { %v936_v60 = vadd.f32 %v930_v57, %v766_v56  ;;  %v895_v12 = vadd.f32 %v889_v55, %v765_v63 }
 0x412   :  { %v2113_v58 = vpop.f32.mrf.mxu0  ;;  %v2121_v59 = vpop.f32.mrf.mxu1 }
 0x413   :  { %v1870_v9 = vmul.f32 -1.442695, %v936_v60 }
 0x414   :  { %v892_v61 = vpop.f32.mrf.mxu0  ;;  %v933_v62 = vpop.f32.mrf.mxu1 }
 0x415   :  { %2324 = vpow2.f32 %v1870_v9 }
 0x416   :  { %v2114_v5 = vpop.f32.mrf.mxu0  ;;  %v2122_v6 = vpop.f32.mrf.mxu1  ;;  %2326 = vtanh.f32 %v895_v12 }
 0x41a   :  { %v2321_v13 = vpop.eup %2320 }
 0x41b   :  { %v2323_v14 = vpop.eup %2322  ;;  %v940_v15 = vadd.f32 1.0, %v2321_v13 }
 0x41c   :  { %v946_v16 = vadd.f32 1.0, %v2323_v14 }
 0x41d   :  { %2328 = vrcp.f32 %v940_v15 }
 0x41e   :  { %2330 = vrcp.f32 %v946_v16 }
 0x422   :  { %v2325_v17 = vpop.eup %2324 }
 0x423   :  { %v2327_v18 = vpop.eup %2326  ;;  %v953_v23 = vadd.f32 1.0, %v2325_v17 }
 0x425   :  { %2332 = vrcp.f32 %v953_v23 }
 0x42a   :  { %v2329_v19 = vpop.eup %2328 }
 0x42b   :  { %v2331_v20 = vpop.eup %2330  ;;  %v957_v22 = vmul.f32 %v2329_v19, %v2327_v18 }
 0x42c   :  { %v956_v24 = vmul.f32 %v2331_v20, %v768_v21 }
 0x42e   :  { %v958_v25 = vadd.f32 %v957_v22, %v956_v24 }
 0x430   :  { %2334 = vtanh.f32 %v958_v25  ;;  %962 = vst.msk [vmem:[#allocation3] sm:$0xff] %vm79_vm1, %v958_v25 }
 0x432   :  { %v2333_v26 = vpop.eup %2332 }
 0x437   :  { %v972_v12 = vld [vmem:[#allocation3] sm:$0xff] }
 0x43d   :  { %v2335_v27 = vpop.eup %2334 }
 0x43e   :  { %v960_v28 = vmul.f32 %v2335_v27, %v2333_v26 }
 0x440   :  { %961 = vst.msk [vmem:[#allocation2] sm:$0xff] %vm79_vm1, %v960_v28  ;;  %v963_v29 = vpack.c.bf16 %v960_v28, %v960_v28 }
 0x442   :  { %965 = vst.msk [vmem:[#allocation12 + $0xc] sm:$0xf] %vm352_vm2, %v963_v29 }
 0x447   :  { %v971_v30 = vld [vmem:[#allocation2] sm:$0xff] }
 0x448   :  { %v973_v31 = vpack.c.bf16 %v971_v30, %v971_v30 }
 0x44a   :  { %2128 = vmatmul.mubr.msk.bf16.vlgmr.msra.gmra.mxu0 %vm79_vm1, %v973_v31  ;;  %2136 = vmatmul.mubr.msk.bf16.vlgmr.msra.gmra.mxu1 %vm79_vm1, %v973_v31 }
 0x44b   :  { %2140 = vmatpush3.bf16.msra.mxu0 %v2644_v7  ;;  %2148 = vmatpush3.bf16.msra.mxu1 %v2646_v8 }
 0x44c   :  { %2141 = vmatprep.subr.bf16.mxu0 %v2566_v0  ;;  %2149 = vmatprep.subr.bf16.mxu1 %v2566_v0 }
 0x44d   :  { %2143 = vmatprep.mubr.msk.bf16.mxu0 %vm2567_vm0, %v2566_v0  ;;  %2151 = vmatprep.mubr.msk.bf16.mxu1 %vm2567_vm0, %v2566_v0 }
 0x44f   :  { %2142 = vmatpush3.bf16.msra.mxu0 %v2652_v10  ;;  %2150 = vmatpush3.bf16.msra.mxu1 %v2654_v11 }
 0x450   :  { %2155 = vmatprep.subr.bf16.mxu0 %v2566_v0  ;;  %2163 = vmatprep.subr.bf16.mxu1 %v2566_v0 }
 0x452   :  { %2144 = vmatmul.mubr.msk.bf16.vlgmr.msra.gmra.mxu0 %vm79_vm1, %v973_v31  ;;  %2152 = vmatmul.mubr.msk.bf16.vlgmr.msra.gmra.mxu1 %vm79_vm1, %v973_v31 }
 0x453   :  { %2156 = vmatpush3.bf16.msra.mxu0 %v2627_v1  ;;  %2164 = vmatpush3.bf16.msra.mxu1 %v2629_v2 }
 0x454   :  { %2157 = vmatprep.subr.bf16.mxu0 %v2566_v0  ;;  %2165 = vmatprep.subr.bf16.mxu1 %v2566_v0 }
 0x455   :  { %2159 = vmatprep.mubr.msk.bf16.mxu0 %vm2567_vm0, %v2566_v0  ;;  %2167 = vmatprep.mubr.msk.bf16.mxu1 %vm2567_vm0, %v2566_v0 }
 0x457   :  { %2158 = vmatpush3.bf16.msra.mxu0 %v2632_v3  ;;  %2166 = vmatpush3.bf16.msra.mxu1 %v2636_v4 }
 0x458   :  { %2171 = vmatprep.subr.bf16.mxu0 %v2566_v0  ;;  %2179 = vmatprep.subr.bf16.mxu1 %v2566_v0 }
 0x50a   :  { %v1011_v34 = vpop.f32.mrf.mxu0  ;;  %v1052_v35 = vpop.f32.mrf.mxu1 }
 0x50b   :  { %v1017_v36 = vadd.f32 %v1011_v34, %v967_v32  ;;  %v1058_v37 = vadd.f32 %v1052_v35, %v968_v33  ;;  %v1174_v34 = vld [vmem:[#allocation4 + $0xb8] sm:$0xff] }
 0x50c   :  { %v2129_v38 = vpop.f32.mrf.mxu0  ;;  %v2137_v39 = vpop.f32.mrf.mxu1 }
 0x50d   :  { %v1875_v40 = vmul.f32 -1.442695, %v1017_v36  ;;  %v1876_v41 = vmul.f32 -1.442695, %v1058_v37 }
 0x50e   :  { %v1014_v42 = vpop.f32.mrf.mxu0  ;;  %v1055_v43 = vpop.f32.mrf.mxu1 }
 0x50f   :  { %2336 = vpow2.f32 %v1875_v40 }
 0x510   :  { %2338 = vpow2.f32 %v1876_v41  ;;  %v2130_v44 = vpop.f32.mrf.mxu0  ;;  %v2138_v45 = vpop.f32.mrf.mxu1  ;;  %v1173_v41 = vld [vmem:[#allocation4 + $0xb0] sm:$0xff] }
 0x512   :  { %v1093_v46 = vpop.f32.mrf.mxu0  ;;  %v1134_v48 = vpop.f32.mrf.mxu1 }
 0x513   :  { %v1140_v51 = vadd.f32 %v1134_v48, %v970_v47  ;;  %v1099_v58 = vadd.f32 %v1093_v46, %v969_v54 }
 0x514   :  { %v2145_v49 = vpop.f32.mrf.mxu0  ;;  %v2153_v50 = vpop.f32.mrf.mxu1 }
 0x515   :  { %v1877_v57 = vmul.f32 -1.442695, %v1140_v51 }
 0x516   :  { %v1096_v52 = vpop.f32.mrf.mxu0  ;;  %v1137_v53 = vpop.f32.mrf.mxu1 }
 0x517   :  { %2340 = vpow2.f32 %v1877_v57 }
 0x518   :  { %v2146_v55 = vpop.f32.mrf.mxu0  ;;  %v2154_v56 = vpop.f32.mrf.mxu1  ;;  %2342 = vtanh.f32 %v1099_v58 }
 0x51c   :  { %v2337_v59 = vpop.eup %2336 }
 0x51d   :  { %v2339_v60 = vpop.eup %2338  ;;  %v1144_v61 = vadd.f32 1.0, %v2337_v59 }
 0x51e   :  { %v1150_v62 = vadd.f32 1.0, %v2339_v60 }
 0x51f   :  { %2344 = vrcp.f32 %v1144_v61 }
 0x520   :  { %2346 = vrcp.f32 %v1150_v62 }
 0x524   :  { %v2341_v63 = vpop.eup %2340 }
 0x525   :  { %v2343_v5 = vpop.eup %2342  ;;  %v1157_v14 = vadd.f32 1.0, %v2341_v63 }
 0x527   :  { %2348 = vrcp.f32 %v1157_v14 }
 0x52c   :  { %v2345_v6 = vpop.eup %2344 }
 0x52d   :  { %v2347_v9 = vpop.eup %2346  ;;  %v1161_v13 = vmul.f32 %v2345_v6, %v2343_v5  ;;  %v1375_v6 = vld [vmem:[#allocation4 + $0xc0] sm:$0xff] }
 0x52e   :  { %v1160_v15 = vmul.f32 %v2347_v9, %v972_v12  ;;  %v1376_v9 = vld [vmem:[#allocation4 + $0xc8] sm:$0xff] }
 0x530   :  { %v1162_v16 = vadd.f32 %v1161_v13, %v1160_v15 }
 0x532   :  { %2350 = vtanh.f32 %v1162_v16  ;;  %1166 = vst.msk [vmem:[#allocation3] sm:$0xff] %vm79_vm1, %v1162_v16 }
 0x534   :  { %v2349_v17 = vpop.eup %2348 }
 0x539   :  { %v1176_v54 = vld [vmem:[#allocation3] sm:$0xff] }
 0x53f   :  { %v2351_v18 = vpop.eup %2350 }
 0x540   :  { %v1164_v19 = vmul.f32 %v2351_v18, %v2349_v17 }
 0x542   :  { %1165 = vst.msk [vmem:[#allocation2] sm:$0xff] %vm79_vm1, %v1164_v19  ;;  %v1167_v20 = vpack.c.bf16 %v1164_v19, %v1164_v19 }
 0x544   :  { %1169 = vst.msk [vmem:[#allocation12 + $0x10] sm:$0xf] %vm352_vm2, %v1167_v20 }
 0x549   :  { %v1175_v21 = vld [vmem:[#allocation2] sm:$0xff] }
 0x54a   :  { %v1177_v22 = vpack.c.bf16 %v1175_v21, %v1175_v21 }
 0x54c   :  { %2160 = vmatmul.mubr.msk.bf16.vlgmr.msra.gmra.mxu0 %vm79_vm1, %v1177_v22  ;;  %2168 = vmatmul.mubr.msk.bf16.vlgmr.msra.gmra.mxu1 %vm79_vm1, %v1177_v22 }
 0x54d   :  { %2172 = vmatpush3.bf16.msra.mxu0 %v2644_v7  ;;  %2180 = vmatpush3.bf16.msra.mxu1 %v2646_v8 }
 0x54e   :  { %2173 = vmatprep.subr.bf16.mxu0 %v2566_v0  ;;  %2181 = vmatprep.subr.bf16.mxu1 %v2566_v0 }
 0x54f   :  { %2175 = vmatprep.mubr.msk.bf16.mxu0 %vm2567_vm0, %v2566_v0  ;;  %2183 = vmatprep.mubr.msk.bf16.mxu1 %vm2567_vm0, %v2566_v0 }
 0x551   :  { %2174 = vmatpush3.bf16.msra.mxu0 %v2652_v10  ;;  %2182 = vmatpush3.bf16.msra.mxu1 %v2654_v11 }
 0x552   :  { %2187 = vmatprep.subr.bf16.mxu0 %v2566_v0  ;;  %2195 = vmatprep.subr.bf16.mxu1 %v2566_v0 }
 0x554   :  { %2176 = vmatmul.mubr.msk.bf16.vlgmr.msra.gmra.mxu0 %vm79_vm1, %v1177_v22  ;;  %2184 = vmatmul.mubr.msk.bf16.vlgmr.msra.gmra.mxu1 %vm79_vm1, %v1177_v22 }
 0x555   :  { %2188 = vmatpush3.bf16.msra.mxu0 %v2627_v1  ;;  %2196 = vmatpush3.bf16.msra.mxu1 %v2629_v2  ;;  %v1171_v1 = vld [vmem:[#allocation4 + $0xa0] sm:$0xff]  ;;  %v1172_v2 = vld [vmem:[#allocation4 + $0xa8] sm:$0xff] }
 0x556   :  { %2189 = vmatprep.subr.bf16.mxu0 %v2566_v0  ;;  %2197 = vmatprep.subr.bf16.mxu1 %v2566_v0 }
 0x557   :  { %2191 = vmatprep.mubr.msk.bf16.mxu0 %vm2567_vm0, %v2566_v0  ;;  %2199 = vmatprep.mubr.msk.bf16.mxu1 %vm2567_vm0, %v2566_v0 }
 0x559   :  { %2190 = vmatpush3.bf16.msra.mxu0 %v2632_v3  ;;  %2198 = vmatpush3.bf16.msra.mxu1 %v2636_v4 }
 0x55a   :  { %2203 = vmatprep.subr.bf16.mxu0 %v2566_v0  ;;  %2211 = vmatprep.subr.bf16.mxu1 %v2566_v0 }
 0x60c   :  { %v1215_v23 = vpop.f32.mrf.mxu0  ;;  %v1256_v24 = vpop.f32.mrf.mxu1 }
 0x60d   :  { %v1221_v25 = vadd.f32 %v1215_v23, %v1171_v1  ;;  %v1262_v26 = vadd.f32 %v1256_v24, %v1172_v2  ;;  %v1378_v23 = vld [vmem:[#allocation4 + $0xd8] sm:$0xff] }
 0x60e   :  { %v2161_v27 = vpop.f32.mrf.mxu0  ;;  %v2169_v28 = vpop.f32.mrf.mxu1 }
 0x60f   :  { %v1882_v29 = vmul.f32 -1.442695, %v1221_v25  ;;  %v1883_v30 = vmul.f32 -1.442695, %v1262_v26 }
 0x610   :  { %v1218_v31 = vpop.f32.mrf.mxu0  ;;  %v1259_v32 = vpop.f32.mrf.mxu1 }
 0x611   :  { %2352 = vpow2.f32 %v1882_v29 }
 0x612   :  { %2354 = vpow2.f32 %v1883_v30  ;;  %v2162_v3 = vpop.f32.mrf.mxu0  ;;  %v2170_v4 = vpop.f32.mrf.mxu1  ;;  %v1377_v30 = vld [vmem:[#allocation4 + $0xd0] sm:$0xff] }
 0x614   :  { %v1297_v33 = vpop.f32.mrf.mxu0  ;;  %v1338_v35 = vpop.f32.mrf.mxu1 }
 0x615   :  { %v1344_v38 = vadd.f32 %v1338_v35, %v1174_v34  ;;  %v1303_v45 = vadd.f32 %v1297_v33, %v1173_v41 }
 0x616   :  { %v2177_v36 = vpop.f32.mrf.mxu0  ;;  %v2185_v37 = vpop.f32.mrf.mxu1 }
 0x617   :  { %v1884_v44 = vmul.f32 -1.442695, %v1344_v38 }
 0x618   :  { %v1300_v39 = vpop.f32.mrf.mxu0  ;;  %v1341_v40 = vpop.f32.mrf.mxu1 }
 0x619   :  { %2356 = vpow2.f32 %v1884_v44 }
 0x61a   :  { %v2178_v42 = vpop.f32.mrf.mxu0  ;;  %v2186_v43 = vpop.f32.mrf.mxu1  ;;  %2358 = vtanh.f32 %v1303_v45 }
 0x61e   :  { %v2353_v46 = vpop.eup %2352 }
 0x61f   :  { %v2355_v47 = vpop.eup %2354  ;;  %v1348_v48 = vadd.f32 1.0, %v2353_v46 }
 0x620   :  { %v1354_v49 = vadd.f32 1.0, %v2355_v47 }
 0x621   :  { %2360 = vrcp.f32 %v1348_v48 }
 0x622   :  { %2362 = vrcp.f32 %v1354_v49 }
 0x626   :  { %v2357_v50 = vpop.eup %2356 }
 0x627   :  { %v2359_v51 = vpop.eup %2358  ;;  %v1361_v56 = vadd.f32 1.0, %v2357_v50 }
 0x629   :  { %2364 = vrcp.f32 %v1361_v56  ;;  %v1579_v56 = vld [vmem:[#allocation4 + $0xe0] sm:$0xff] }
 0x62e   :  { %v2361_v52 = vpop.eup %2360 }
 0x62f   :  { %v2363_v53 = vpop.eup %2362  ;;  %v1365_v55 = vmul.f32 %v2361_v52, %v2359_v51  ;;  %v2404_v52 = vld [vmem:[#allocation7 + $0x28] sm:$0xff]  }
 0x630   :  { %v1364_v57 = vmul.f32 %v2363_v53, %v1176_v54  ;;  %v2405_v53 = vld [vmem:[#allocation7 + $0x38] sm:$0xff]   ;;  %v2406_v54 = vld [vmem:[#allocation7 + $0x20] sm:$0xff]  }
 0x632   :  { %v1366_v58 = vadd.f32 %v1365_v55, %v1364_v57  ;;  %v2407_v55 = vld [vmem:[#allocation7 + $0x30] sm:$0xff]   ;;  %v1580_v57 = vld [vmem:[#allocation4 + $0xe8] sm:$0xff] }
 0x634   :  { %2366 = vtanh.f32 %v1366_v58  ;;  %1370 = vst.msk [vmem:[#allocation3] sm:$0xff] %vm79_vm1, %v1366_v58 }
 0x636   :  { %v2365_v59 = vpop.eup %2364 }
 0x63b   :  { %v1380_v41 = vld [vmem:[#allocation3] sm:$0xff] }
 0x641   :  { %v2367_v60 = vpop.eup %2366 }
 0x642   :  { %v1368_v61 = vmul.f32 %v2367_v60, %v2365_v59 }
 0x644   :  { %1369 = vst.msk [vmem:[#allocation2] sm:$0xff] %vm79_vm1, %v1368_v61  ;;  %v1371_v62 = vpack.c.bf16 %v1368_v61, %v1368_v61 }
 0x646   :  { %1373 = vst.msk [vmem:[#allocation12 + $0x14] sm:$0xf] %vm352_vm2, %v1371_v62 }
 0x64b   :  { %v1379_v63 = vld [vmem:[#allocation2] sm:$0xff] }
 0x64c   :  { %v1381_v5 = vpack.c.bf16 %v1379_v63, %v1379_v63 }
 0x64e   :  { %2192 = vmatmul.mubr.msk.bf16.vlgmr.msra.gmra.mxu0 %vm79_vm1, %v1381_v5  ;;  %2200 = vmatmul.mubr.msk.bf16.vlgmr.msra.gmra.mxu1 %vm79_vm1, %v1381_v5 }
 0x64f   :  { %2204 = vmatpush3.bf16.msra.mxu0 %v2644_v7  ;;  %2212 = vmatpush3.bf16.msra.mxu1 %v2646_v8  ;;  %v2400_v7 = vld [vmem:[#allocation7 + $0x8] sm:$0xff]   ;;  %v2401_v8 = vld [vmem:[#allocation7 + $0x18] sm:$0xff]  }
 0x650   :  { %2205 = vmatprep.subr.bf16.mxu0 %v2566_v0  ;;  %2213 = vmatprep.subr.bf16.mxu1 %v2566_v0 }
 0x651   :  { %2207 = vmatprep.mubr.msk.bf16.mxu0 %vm2567_vm0, %v2566_v0  ;;  %2215 = vmatprep.mubr.msk.bf16.mxu1 %vm2567_vm0, %v2566_v0 }
 0x653   :  { %2206 = vmatpush3.bf16.msra.mxu0 %v2652_v10  ;;  %2214 = vmatpush3.bf16.msra.mxu1 %v2654_v11  ;;  %v2402_v10 = vld [vmem:[#allocation7] sm:$0xff]   ;;  %v2403_v11 = vld [vmem:[#allocation7 + $0x10] sm:$0xff]  }
 0x654   :  { %2219 = vmatprep.subr.bf16.mxu0 %v2566_v0  ;;  %2227 = vmatprep.subr.bf16.mxu1 %v2566_v0 }
 0x656   :  { %2208 = vmatmul.mubr.msk.bf16.vlgmr.msra.gmra.mxu0 %vm79_vm1, %v1381_v5  ;;  %2216 = vmatmul.mubr.msk.bf16.vlgmr.msra.gmra.mxu1 %vm79_vm1, %v1381_v5 }
 0x657   :  { %2220 = vmatpush3.bf16.msra.mxu0 %v2400_v7  ;;  %2228 = vmatpush3.bf16.msra.mxu1 %v2401_v8 }
 0x658   :  { %2221 = vmatprep.subr.bf16.mxu0 %v2566_v0  ;;  %2229 = vmatprep.subr.bf16.mxu1 %v2566_v0 }
 0x659   :  { %2223 = vmatprep.mubr.msk.bf16.mxu0 %vm2567_vm0, %v2566_v0  ;;  %2231 = vmatprep.mubr.msk.bf16.mxu1 %vm2567_vm0, %v2566_v0 }
 0x65b   :  { %2222 = vmatpush3.bf16.msra.mxu0 %v2402_v10  ;;  %2230 = vmatpush3.bf16.msra.mxu1 %v2403_v11 }
 0x65c   :  { %2235 = vmatprep.subr.bf16.mxu0 %v2566_v0  ;;  %2243 = vmatprep.subr.bf16.mxu1 %v2566_v0 }
 0x70e   :  { %v1419_v12 = vpop.f32.mrf.mxu0  ;;  %v1460_v13 = vpop.f32.mrf.mxu1 }
 0x70f   :  { %v1425_v14 = vadd.f32 %v1419_v12, %v1375_v6  ;;  %v1466_v15 = vadd.f32 %v1460_v13, %v1376_v9  ;;  %v1582_v9 = vld [vmem:[#allocation4 + $0xf8] sm:$0xff] }
 0x710   :  { %v2193_v16 = vpop.f32.mrf.mxu0  ;;  %v2201_v17 = vpop.f32.mrf.mxu1 }
 0x711   :  { %v1889_v18 = vmul.f32 -1.442695, %v1425_v14  ;;  %v1890_v19 = vmul.f32 -1.442695, %v1466_v15 }
 0x712   :  { %v1422_v20 = vpop.f32.mrf.mxu0  ;;  %v1463_v21 = vpop.f32.mrf.mxu1 }
 0x713   :  { %2368 = vpow2.f32 %v1889_v18  ;;  %v1581_v18 = vld [vmem:[#allocation4 + $0xf0] sm:$0xff] }
 0x714   :  { %2370 = vpow2.f32 %v1890_v19  ;;  %v2194_v22 = vpop.f32.mrf.mxu0  ;;  %v2202_v1 = vpop.f32.mrf.mxu1 }
 0x716   :  { %v1501_v2 = vpop.f32.mrf.mxu0  ;;  %v1542_v24 = vpop.f32.mrf.mxu1 }
 0x717   :  { %v1548_v27 = vadd.f32 %v1542_v24, %v1378_v23  ;;  %v1507_v4 = vadd.f32 %v1501_v2, %v1377_v30 }
 0x718   :  { %v2209_v25 = vpop.f32.mrf.mxu0  ;;  %v2217_v26 = vpop.f32.mrf.mxu1 }
 0x719   :  { %v1891_v3 = vmul.f32 -1.442695, %v1548_v27 }
 0x71a   :  { %v1504_v28 = vpop.f32.mrf.mxu0  ;;  %v1545_v29 = vpop.f32.mrf.mxu1 }
 0x71b   :  { %2372 = vpow2.f32 %v1891_v3 }
 0x71c   :  { %v2210_v31 = vpop.f32.mrf.mxu0  ;;  %v2218_v32 = vpop.f32.mrf.mxu1  ;;  %2374 = vtanh.f32 %v1507_v4 }
 0x720   :  { %v2369_v33 = vpop.eup %2368 }
 0x721   :  { %v2371_v34 = vpop.eup %2370  ;;  %v1552_v35 = vadd.f32 1.0, %v2369_v33 }
 0x722   :  { %v1558_v36 = vadd.f32 1.0, %v2371_v34 }
 0x723   :  { %2376 = vrcp.f32 %v1552_v35 }
 0x724   :  { %2378 = vrcp.f32 %v1558_v36 }
 0x728   :  { %v2373_v37 = vpop.eup %2372 }
 0x729   :  { %v2375_v38 = vpop.eup %2374  ;;  %v1565_v43 = vadd.f32 1.0, %v2373_v37 }
 0x72b   :  { %2380 = vrcp.f32 %v1565_v43 }
 0x730   :  { %v2377_v39 = vpop.eup %2376 }
 0x731   :  { %v2379_v40 = vpop.eup %2378  ;;  %v1569_v42 = vmul.f32 %v2377_v39, %v2375_v38 }
 0x732   :  { %v1568_v44 = vmul.f32 %v2379_v40, %v1380_v41 }
 0x734   :  { %v1570_v45 = vadd.f32 %v1569_v42, %v1568_v44 }
 0x736   :  { %2382 = vtanh.f32 %v1570_v45  ;;  %1574 = vst.msk [vmem:[#allocation3] sm:$0xff] %vm79_vm1, %v1570_v45 }
 0x738   :  { %v2381_v46 = vpop.eup %2380 }
 0x73d   :  { %v1584_v29 = vld [vmem:[#allocation3] sm:$0xff] }
 0x743   :  { %v2383_v47 = vpop.eup %2382 }
 0x744   :  { %v1572_v48 = vmul.f32 %v2383_v47, %v2381_v46 }
 0x746   :  { %1573 = vst.msk [vmem:[#allocation2] sm:$0xff] %vm79_vm1, %v1572_v48  ;;  %v1575_v49 = vpack.c.bf16 %v1572_v48, %v1572_v48 }
 0x748   :  { %1577 = vst.msk [vmem:[#allocation12 + $0x18] sm:$0xf] %vm352_vm2, %v1575_v49 }
 0x74d   :  { %v1583_v50 = vld [vmem:[#allocation2] sm:$0xff] }
 0x74e   :  { %v1585_v51 = vpack.c.bf16 %v1583_v50, %v1583_v50 }
 0x750   :  { %2224 = vmatmul.mubr.msk.bf16.vlgmr.msra.gmra.mxu0 %vm79_vm1, %v1585_v51  ;;  %2232 = vmatmul.mubr.msk.bf16.vlgmr.msra.gmra.mxu1 %vm79_vm1, %v1585_v51 }
 0x751   :  { %2236 = vmatpush3.bf16.msra.mxu0 %v2404_v52  ;;  %2244 = vmatpush3.bf16.msra.mxu1 %v2405_v53 }
 0x752   :  { %2237 = vmatprep.subr.bf16.mxu0 %v2566_v0  ;;  %2245 = vmatprep.subr.bf16.mxu1 %v2566_v0 }
 0x753   :  { %2239 = vmatprep.mubr.msk.bf16.mxu0 %vm2567_vm0, %v2566_v0  ;;  %2247 = vmatprep.mubr.msk.bf16.mxu1 %vm2567_vm0, %v2566_v0 }
 0x755   :  { %2238 = vmatpush3.bf16.msra.mxu0 %v2406_v54  ;;  %2246 = vmatpush3.bf16.msra.mxu1 %v2407_v55 }
 0x758   :  { %2240 = vmatmul.mubr.msk.bf16.vlgmr.msra.gmra.mxu0 %vm79_vm1, %v1585_v51  ;;  %2248 = vmatmul.mubr.msk.bf16.vlgmr.msra.gmra.mxu1 %vm79_vm1, %v1585_v51 }
 0x810   :  { %v1623_v58 = vpop.f32.mrf.mxu0  ;;  %v1664_v59 = vpop.f32.mrf.mxu1 }
 0x811   :  { %v1629_v60 = vadd.f32 %v1623_v58, %v1579_v56  ;;  %v1670_v61 = vadd.f32 %v1664_v59, %v1580_v57 }
 0x812   :  { %v2225_v62 = vpop.f32.mrf.mxu0  ;;  %v2233_v63 = vpop.f32.mrf.mxu1 }
 0x813   :  { %v1896_v5 = vmul.f32 -1.442695, %v1629_v60  ;;  %v1897_v7 = vmul.f32 -1.442695, %v1670_v61 }
 0x814   :  { %v1626_v8 = vpop.f32.mrf.mxu0  ;;  %v1667_v0 = vpop.f32.mrf.mxu1 }
 0x815   :  { %2384 = vpow2.f32 %v1896_v5 }
 0x816   :  { %2386 = vpow2.f32 %v1897_v7  ;;  %v2226_v10 = vpop.f32.mrf.mxu0  ;;  %v2234_v11 = vpop.f32.mrf.mxu1 }
 0x818   :  { %v1705_v6 = vpop.f32.mrf.mxu0  ;;  %v1746_v12 = vpop.f32.mrf.mxu1 }
 0x819   :  { %v1752_v15 = vadd.f32 %v1746_v12, %v1582_v9  ;;  %v1711_v22 = vadd.f32 %v1705_v6, %v1581_v18 }
 0x81a   :  { %v2241_v13 = vpop.f32.mrf.mxu0  ;;  %v2249_v14 = vpop.f32.mrf.mxu1 }
 0x81b   :  { %v1898_v21 = vmul.f32 -1.442695, %v1752_v15 }
 0x81c   :  { %v1708_v16 = vpop.f32.mrf.mxu0  ;;  %v1749_v17 = vpop.f32.mrf.mxu1 }
 0x81d   :  { %2388 = vpow2.f32 %v1898_v21 }
 0x81e   :  { %v2242_v19 = vpop.f32.mrf.mxu0  ;;  %v2250_v20 = vpop.f32.mrf.mxu1  ;;  %2390 = vtanh.f32 %v1711_v22 }
 0x822   :  { %v2385_v1 = vpop.eup %2384 }
 0x823   :  { %v2387_v2 = vpop.eup %2386  ;;  %v1756_v23 = vadd.f32 1.0, %v2385_v1 }
 0x824   :  { %v1762_v24 = vadd.f32 1.0, %v2387_v2 }
 0x825   :  { %2392 = vrcp.f32 %v1756_v23 }
 0x826   :  { %2394 = vrcp.f32 %v1762_v24 }
 0x82a   :  { %v2389_v25 = vpop.eup %2388 }
 0x82b   :  { %v2391_v26 = vpop.eup %2390  ;;  %v1769_v31 = vadd.f32 1.0, %v2389_v25 }
 0x82d   :  { %2396 = vrcp.f32 %v1769_v31 }
 0x832   :  { %v2393_v27 = vpop.eup %2392 }
 0x833   :  { %v2395_v28 = vpop.eup %2394  ;;  %v1773_v30 = vmul.f32 %v2393_v27, %v2391_v26 }
 0x834   :  { %v1772_v32 = vmul.f32 %v2395_v28, %v1584_v29 }
 0x836   :  { %v1774_v3 = vadd.f32 %v1773_v30, %v1772_v32 }
 0x838   :  { %2398 = vtanh.f32 %v1774_v3  ;;  %1778 = vst.msk [vmem:[#allocation3] sm:$0xff] %vm79_vm1, %v1774_v3 }
 0x83a   :  { %v2397_v33 = vpop.eup %2396 }
 0x83f   :  { %v1787_v4 = vld [vmem:[#allocation3] sm:$0xff] }
 0x840   :  { %1788 = vst.msk [vmem:[#allocation15] sm:$0xff] %vm79_vm1, %v1787_v4 }
 0x845   :  { %v2399_v34 = vpop.eup %2398 }
 0x846   :  { %v1776_v35 = vmul.f32 %v2399_v34, %v2397_v33 }
 0x848   :  { %1777 = vst.msk [vmem:[#allocation2] sm:$0xff] %vm79_vm1, %v1776_v35  ;;  %v1779_v36 = vpack.c.bf16 %v1776_v35, %v1776_v35 }
 0x84a   :  { %1781 = vst.msk [vmem:[#allocation12 + $0x1c] sm:$0xf] %vm352_vm2, %v1779_v36 }
 0x84b   :  { %2499 = shalt.err (!%p2496_p10)
}
 0x84c   :  { %1800 = dma.vmem_to_hbm [thread:$0]  %s1795_s3, 512, %s2897_s4, [#allocation6], %s2559_s24, %s2559_s24, %s2560_s25  }
 0x84d   :  { %s2570_s26 = smov [#allocation15]   ;;  %s2508_s28 = scalar_lea.vmem %s1808_s20, 128 }
 0x84e   :  { %s1817_s27 = sshll.u32 %s2570_s26, 4  ;;  %p2509_p11 = scmp.ne.s32.totalorder %s1808_s20, %s2508_s28  ;;  %s1818_s27 = int_to_ptr.vmem [resolvable:$true] %s1817_s27 }
 0x84f   :  { %v1785_v37 = vld [vmem:[#allocation2] sm:$0xff]  ;;  %p2513_p12 = scmp.lt.s32.totalorder %s1808_s20, %s1808_s20  ;;  %p2514_p13 = scmp.lt.s32.totalorder %s2508_s28, %s2508_s28 }
 0x850   :  { %1786 = vst.msk [vmem:[#allocation13] sm:$0xff] %vm79_vm1, %v1785_v37 }
 0x851   :  { %p2515_p0 = por %p2514_p13, %p2513_p12 }
 0x853   :  { %p2516_p1 = pnand %p2515_p0, %p2509_p11 }
 0x855   :  { %2519 = shalt.err (!%p2516_p1)
}
 0x856   :  { %1810 = dma.vmem_to_hbm [thread:$0]  %s1808_s20, 128, %s2898_s5, [#allocation14]  }
 0x857   :  { %s2528_s7 = scalar_lea.vmem %s1818_s27, 128  ;;  %p2533_p3 = scmp.lt.s32.totalorder %s1818_s27, %s1818_s27 }
 0x858   :  { %p2529_p2 = scmp.ne.s32.totalorder %s1818_s27, %s2528_s7  ;;  %p2534_p4 = scmp.lt.s32.totalorder %s2528_s7, %s2528_s7 }
 0x85a   :  { %p2535_p5 = por %p2534_p4, %p2533_p3 }
 0x85c   :  { %p2536_p6 = pnand %p2535_p5, %p2529_p2 }
 0x85e   :  { %2539 = shalt.err (!%p2536_p6)
}
 0x85f   :  { %1820 = dma.vmem_to_hbm [thread:$0]  %s1818_s27, 128, %s2899_s6, [#allocation14]  }
 0x860   :  { %2554 = dma.done.wait [#allocation6], 512  }
 0x861   :  { %2555 = vsyncadd [#allocation6], 4294966784 }
 0x862   :  { %2556 = dma.done.wait [#allocation14], 256  }
 0x863   :  { %2557 = vsyncadd [#allocation14], 4294967040 }
 0x864   :  { %1830 = vsyncpa [#allocation5], 1 }
 0x865   :  { %1831 = vsyncpa [#allocation8], 1 }
 0x866   :  { %1832 = vsyncpa [#allocation11], 1 }
 0x867   :  { %1833 = vsyncpa [#allocation6], 1 }
 0x868   :  { %1834 = vsyncpa [#allocation14], 1 }

</bundles_post_ra>
